<compile_context>
chip_gen: v7x
topology: tpu7x:2x2x1
jax: 0.10.0
libtpu: 0.0.40
codegen_flags: <defaults>
</compile_context>

<pallas_src>
import functools

import jax
import jax.numpy as jnp
from jax import lax
from jax.experimental import pallas as pl
from jax.experimental.pallas import tpu as pltpu


# --------------------------------------------------------------------------
# Kernel
# --------------------------------------------------------------------------
def _cross_attn_kernel(x_ref, z_ref, wq_ref, wkv_ref, wp_ref, bp_ref,
                       out_ref, kv_ref, ctx_ref,
                       *, num_heads, head_dim, scale):
    C = num_heads * head_dim

    # ---- KV projection: once per batch. The query-tile axis is the inner,
    # sequential ("arbitrary") grid axis, so kv_ref persists across all query
    # tiles of the current batch and is refreshed when the batch changes
    # (program_id(1) resets to 0). z's block index only changes with the
    # batch, so it is not re-DMA'd between query tiles either.
    @pl.when(pl.program_id(1) == 0)
    def _():
        z = z_ref[...].astype(jnp.bfloat16)                       # (N_z, C)
        kv_ref[...] = jnp.dot(
            z, wkv_ref[...], preferred_element_type=jnp.float32
        ).astype(jnp.bfloat16)                                    # (N_z, 2C)

    # ---- Q projection for this query tile (full-C contraction on the MXU).
    x = x_ref[...].astype(jnp.bfloat16)                           # (tq, C)
    q = jnp.dot(x, wq_ref[...],
                preferred_element_type=jnp.float32).astype(jnp.bfloat16)

    if head_dim % 128 == 0:
        # ---- Head-batched path (lane-tile aligned): one batched dot_general
        # for all scores and one for all PV products; the final head merge is
        # a tile-aligned reshape (free for hd % 128 == 0).
        H = num_heads
        k = kv_ref[:, :C]                                         # (N_z, C)
        v = kv_ref[:, C:]                                         # (N_z, C)
        tq, n_z = q.shape[0], k.shape[0]
        qh = jnp.transpose(q.reshape(tq, H, head_dim), (1, 0, 2))   # (H,tq,hd)
        kh = jnp.transpose(k.reshape(n_z, H, head_dim), (1, 0, 2))  # (H,Nz,hd)
        vh = jnp.transpose(v.reshape(n_z, H, head_dim), (1, 0, 2))  # (H,Nz,hd)
        s = jnp.einsum("hqd,hkd->hqk", qh, kh,
                       preferred_element_type=jnp.float32) * scale  # f32
        s = s - jnp.max(s, axis=-1, keepdims=True)
        p = jnp.exp(s)
        p = p * pl.reciprocal(jnp.sum(p, axis=-1, keepdims=True), approx=True)
        ctx = jnp.einsum("hqk,hkd->hqd", p.astype(jnp.bfloat16), vh,
                         preferred_element_type=jnp.float32)         # (H,tq,hd)
        ctx = jnp.transpose(ctx, (1, 0, 2)).reshape(tq, C).astype(jnp.bfloat16)
    else:
        # ---- Per-head path (head_dim < 128): static loop over heads, each
        # head's context written to a (tq, C) VMEM scratch at a static column
        # slice (avoids a lane-axis concat of sub-128-wide pieces).
        # TODO(synk): if bundle dumps show vreg spills for large tq*N_z, switch
        # to lax.fori_loop over heads with pl.ds column slices.
        dims = (((1,), (1,)), ((), ()))      # contract last dims, no batch
        for h in range(num_heads):
            c0, c1 = h * head_dim, (h + 1) * head_dim
            qh = q[:, c0:c1]                  # (tq,  hd) bf16
            kh = kv_ref[:, c0:c1]             # (N_z, hd) bf16
            vh = kv_ref[:, C + c0:C + c1]     # (N_z, hd) bf16
            s = lax.dot_general(qh, kh, dims,
                                preferred_element_type=jnp.float32) * scale
            s = s - jnp.max(s, axis=-1, keepdims=True)
            p = jnp.exp(s)
            p = p * pl.reciprocal(jnp.sum(p, axis=-1, keepdims=True),
                                  approx=True)
            ctx_ref[:, c0:c1] = jnp.dot(
                p.astype(jnp.bfloat16), vh,
                preferred_element_type=jnp.float32).astype(jnp.bfloat16)
        ctx = ctx_ref[...]                    # (tq, C) bf16

    # ---- Single full-C output projection + bias.
    out = jnp.dot(ctx, wp_ref[...], preferred_element_type=jnp.float32)
    out = out + bp_ref[...]                   # (1, C) f32 bias broadcast
    out_ref[...] = out.astype(out_ref.dtype)


# --------------------------------------------------------------------------
# VMEM-budget-aware tiling helpers
# --------------------------------------------------------------------------
_VMEM_TILE_BUDGET = 44 * 1024 * 1024   # conservative vs. v7x's 64 MiB per TC


def _vmem_estimate_bytes(tq, n_z, C, act_bytes, out_bytes):
    """Rough per-core VMEM footprint (double-buffered pipeline blocks,
    default-double-buffered weights, persistent scratch, f32 temporaries)."""
    x_tile = 2 * tq * C * act_bytes
    o_tile = 2 * tq * C * out_bytes
    z_blk = 2 * n_z * C * act_bytes
    weights = 2 * ((C * C) + (C * 2 * C) + (C * C)) * 2 + 2 * C * 4
    kv_scr = n_z * 2 * C * 2
    ctx_scr = tq * C * 2
    temps = 2 * tq * n_z * 4 + 2 * tq * C * 4
    return x_tile + o_tile + z_blk + weights + kv_scr + ctx_scr + temps


def _pick_query_tile(N, n_z, C, act_bytes, out_bytes,
                     budget=_VMEM_TILE_BUDGET):
    """Largest query tile (multiple of 16 preferred; bf16 packs (16,128))
    dividing N that fits the VMEM budget."""
    for tq in (1024, 512, 256, 128, 64, 32, 16, 8):
        if N % tq == 0 and _vmem_estimate_bytes(
                tq, n_z, C, act_bytes, out_bytes) <= budget:
            return tq
    return N   # block == full dim is always layout-legal


# --------------------------------------------------------------------------
# Wrapper
# --------------------------------------------------------------------------
def prepare_params(params):
    """One-time kernel-layout weight prep (transpose + bf16 cast). Do this
    OUTSIDE the per-call hot path: repeated per-call weight re-layout is an
    un-hidden HBM round trip."""
    C = params["q_w"].shape[0]
    return {
        "wq": params["q_w"].T.astype(jnp.bfloat16),          # (C, C)
        "wkv": params["kv_w"].T.astype(jnp.bfloat16),         # (C, 2C)
        "wp": params["proj_w"].T.astype(jnp.bfloat16),        # (C, C)
        "bp": params["proj_b"].reshape(1, C).astype(jnp.float32),
    }


def cross_attention(z, x, kparams, num_heads, *, query_block=None):
    """z: (B, N_z, C) kv source, x: (B, N, C) query source -> (B, N, C)."""
    B, N, C = x.shape
    _, N_z, _ = z.shape
    assert C % num_heads == 0
    hd = C // num_heads
    scale = float(hd) ** -0.5
    out_dtype = x.dtype

    act_bytes = jnp.dtype(x.dtype).itemsize
    out_bytes = jnp.dtype(out_dtype).itemsize

    if query_block is None:
        tq = _pick_query_tile(N, N_z, C, act_bytes, out_bytes)
    else:
        tq = query_block
    assert N % tq == 0, (N, tq)
    nq = N // tq

    est = _vmem_estimate_bytes(tq, N_z, C, act_bytes, out_bytes)
    # Explicit scoped-VMEM limit (v5e default is only 16 MiB); clamp to v7x's
    # 64 MiB physical so the same config compiles on every generation.
    vmem_limit = int(min(64 * 1024 * 1024, max(2 * est, 16 * 1024 * 1024)))

    kernel = functools.partial(_cross_attn_kernel, num_heads=num_heads,
                               head_dim=hd, scale=scale)

    # TODO(synk): flash-style N_z tiling (online softmax over KV chunks) once
    # N_z*C no longer fits the budget above; and pipeline_mode=pl.Buffered(1)
    # on the constant-index weight specs to halve their VMEM when supported in
    # top-level pallas_call. Pad C (and N_z) to multiples of 128 at the model
    # boundary for lane-dense stores.
    return pl.pallas_call(
        kernel,
        out_shape=jax.ShapeDtypeStruct((B, N, C), out_dtype),
        grid_spec=pltpu.PrefetchScalarGridSpec(
            num_scalar_prefetch=0,
            # Batch outer ("parallel": megacore sharding on v7x needs B >= 2),
            # query tiles inner ("arbitrary": KV scratch carries across them).
            grid=(B, nq),
            in_specs=[
                pl.BlockSpec((pl.Squeezed(), tq, C),
                             lambda b, i: (b, i, 0)),                 # x
                pl.BlockSpec((pl.Squeezed(), N_z, C),
                             lambda b, i: (b, 0, 0)),                 # z
                pl.BlockSpec((C, C), lambda b, i: (0, 0)),            # wq
                pl.BlockSpec((C, 2 * C), lambda b, i: (0, 0)),        # wkv
                pl.BlockSpec((C, C), lambda b, i: (0, 0)),            # wp
                pl.BlockSpec((1, C), lambda b, i: (0, 0)),            # proj bias
            ],
            out_specs=pl.BlockSpec((pl.Squeezed(), tq, C),
                                   lambda b, i: (b, i, 0)),
            scratch_shapes=[
                pltpu.VMEM((N_z, 2 * C), jnp.bfloat16),   # per-batch K|V
                pltpu.VMEM((tq, C), jnp.bfloat16),        # per-tile contexts
            ],
        ),
        compiler_params=pltpu.CompilerParams(
            dimension_semantics=("parallel", "arbitrary"),
            vmem_limit_bytes=vmem_limit),
    )(x, z, kparams["wq"], kparams["wkv"], kparams["wp"], kparams["bp"])


# --------------------------------------------------------------------------
# Pure-JAX reference (mirrors the PyTorch forward, f32)
# --------------------------------------------------------------------------
def cross_attention_ref(z, x, params, num_heads):
    B, N, C = x.shape
    N_z = z.shape[1]
    hd = C // num_heads
    scale = hd ** (-0.5)
    q = x @ params["q_w"].T                                   # (B, N, C)
    kv = z @ params["kv_w"].T                                 # (B, N_z, 2C)
    q = q.reshape(B, N, num_heads, hd).transpose(0, 2, 1, 3)  # (B, H, N, hd)
    kv = kv.reshape(B, N_z, 2, num_heads, hd).transpose(2, 0, 3, 1, 4)
    k, v = kv[0], kv[1]                                       # (B, H, N_z, hd)
    attn = jnp.einsum("bhnd,bhmd->bhnm", q, k) * scale
    attn = jax.nn.softmax(attn, axis=-1)
    out = jnp.einsum("bhnm,bhmd->bhnd", attn, v)
    out = out.transpose(0, 2, 1, 3).reshape(B, N, C)
    return out @ params["proj_w"].T + params["proj_b"]


# --------------------------------------------------------------------------
# Test
# --------------------------------------------------------------------------
if __name__ == "__main__":
    def run_case(B, N, N_z, C, H, query_block, tag):
        key = jax.random.PRNGKey(0)
        kx, kz, k1, k2, k3, k4 = jax.random.split(key, 6)
        x = jax.random.normal(kx, (B, N, C), dtype=jnp.float32)
        z = jax.random.normal(kz, (B, N_z, C), dtype=jnp.float32)
        params = {
            # nn.Linear layout: (out_features, in_features); qkv_bias=False
            "q_w": 0.05 * jax.random.normal(k1, (C, C), dtype=jnp.float32),
            "kv_w": 0.05 * jax.random.normal(k2, (2 * C, C), dtype=jnp.float32),
            "proj_w": 0.05 * jax.random.normal(k3, (C, C), dtype=jnp.float32),
            "proj_b": 0.05 * jax.random.normal(k4, (C,), dtype=jnp.float32),
        }
        kparams = prepare_params(params)   # one-time weight re-layout
        out = cross_attention(z, x, kparams, num_heads=H,
                              query_block=query_block)
        out = jax.block_until_ready(out)
        ref = cross_attention_ref(z, x, params, num_heads=H)
        assert out.shape == (B, N, C)
        max_err = float(jnp.max(jnp.abs(out - ref)))
        # bf16 MXU operands + approx reciprocal -> loosened tolerance.
        assert max_err < 2e-2, (tag, max_err)

    # Small-head path (head_dim = 4 < 128 -> per-head loop + ctx scratch);
    # query_block=16 forces nq=2 so the persistent per-batch KV scratch is
    # reused across query tiles.
    run_case(B=2, N=32, N_z=8, C=32, H=8, query_block=16, tag="small_heads")

    # head_dim = 128 path (head-batched dot_general); auto tile picker.
    run_case(B=2, N=32, N_z=16, C=256, H=2, query_block=None, tag="hd128")

    print("KERNEL_OK")
</pallas_src>

<mosaic_0001>
module attributes {stable_mosaic.version = 11 : i64} {
  func.func @_cross_attn_kernel(%arg0: i32, %arg1: i32, %arg2: memref<1x16x32xf32, #tpu.memory_space<vmem>>, %arg3: memref<1x8x32xf32, #tpu.memory_space<vmem>>, %arg4: memref<32x32xbf16, #tpu.memory_space<vmem>>, %arg5: memref<32x64xbf16, #tpu.memory_space<vmem>>, %arg6: memref<32x32xbf16, #tpu.memory_space<vmem>>, %arg7: memref<1x32xf32, #tpu.memory_space<vmem>>, %arg8: memref<1x16x32xf32, #tpu.memory_space<vmem>>, %arg9: memref<8x64xbf16, #tpu.memory_space<vmem>>, %arg10: memref<16x32xbf16, #tpu.memory_space<vmem>>) attributes {dimension_semantics = [#tpu.dimension_semantics<parallel>, #tpu.dimension_semantics<arbitrary>], iteration_bounds = array<i64: 2, 2>, scalar_prefetch = 0 : i64, scratch_operands = 2 : i64, tpu.core_type = #tpu.core_type<tc>, window_params = [{transform_indices = @transform_0, window_bounds = array<i64: 1, 16, 32>}, {transform_indices = @transform_1, window_bounds = array<i64: 1, 8, 32>}, {pipeline_mode = #tpu.pipeline_mode<synchronous>, transform_indices = @transform_2, window_bounds = array<i64: 32, 32>}, {pipeline_mode = #tpu.pipeline_mode<synchronous>, transform_indices = @transform_3, window_bounds = array<i64: 32, 64>}, {pipeline_mode = #tpu.pipeline_mode<synchronous>, transform_indices = @transform_4, window_bounds = array<i64: 32, 32>}, {pipeline_mode = #tpu.pipeline_mode<synchronous>, transform_indices = @transform_5, window_bounds = array<i64: 1, 32>}, {transform_indices = @transform_6, window_bounds = array<i64: 1, 16, 32>}]} {
    %c0_i32 = arith.constant 0 : i32
    %0 = arith.cmpi eq, %arg1, %c0_i32 : i32
    %1 = arith.extui %0 : i1 to i32
    %c0_i32_0 = arith.constant 0 : i32
    %2 = arith.cmpi ne, %1, %c0_i32_0 : i32
    scf.if %2 {
      %c0_88 = arith.constant 0 : index
      %c0_89 = arith.constant 0 : index
      %c0_90 = arith.constant 0 : index
      %178 = vector.load %arg3[%c0_88, %c0_89, %c0_90] : memref<1x8x32xf32, #tpu.memory_space<vmem>>, vector<1x8x32xf32>
      %179 = vector.shape_cast %178 : vector<1x8x32xf32> to vector<8x32xf32>
      %180 = arith.truncf %179 : vector<8x32xf32> to vector<8x32xbf16>
      %c0_91 = arith.constant 0 : index
      %c0_92 = arith.constant 0 : index
      %181 = vector.load %arg5[%c0_91, %c0_92] : memref<32x64xbf16, #tpu.memory_space<vmem>>, vector<32x64xbf16>
      %cst_93 = arith.constant dense<0.000000e+00> : vector<8x64xf32>
      %182 = tpu.matmul %180, %181, %cst_93 {dimension_numbers = #tpu.dot_dimension_numbers<[1], [0], [0], [1], [0, 0, 1, 1], [], []>} : vector<8x32xbf16>, vector<32x64xbf16>, vector<8x64xf32> -> vector<8x64xf32>
      %183 = arith.truncf %182 : vector<8x64xf32> to vector<8x64xbf16>
      %c0_94 = arith.constant 0 : index
      %c0_95 = arith.constant 0 : index
      %184 = vector.load %arg9[%c0_94, %c0_95] : memref<8x64xbf16, #tpu.memory_space<vmem>>, vector<8x64xbf16>
      tpu.vector_store %arg9[%c0_94, %c0_95], %183 {strides = array<i32>} : memref<8x64xbf16, #tpu.memory_space<vmem>>, vector<8x64xbf16>,
    } else {
    }
    %c0 = arith.constant 0 : index
    %c0_1 = arith.constant 0 : index
    %c0_2 = arith.constant 0 : index
    %3 = vector.load %arg2[%c0, %c0_1, %c0_2] : memref<1x16x32xf32, #tpu.memory_space<vmem>>, vector<1x16x32xf32>
    %4 = vector.shape_cast %3 : vector<1x16x32xf32> to vector<16x32xf32>
    %5 = arith.truncf %4 : vector<16x32xf32> to vector<16x32xbf16>
    %c0_3 = arith.constant 0 : index
    %c0_4 = arith.constant 0 : index
    %6 = vector.load %arg4[%c0_3, %c0_4] : memref<32x32xbf16, #tpu.memory_space<vmem>>, vector<32x32xbf16>
    %cst = arith.constant dense<0.000000e+00> : vector<16x32xf32>
    %7 = tpu.matmul %5, %6, %cst {dimension_numbers = #tpu.dot_dimension_numbers<[1], [0], [0], [1], [0, 0, 1, 1], [], []>} : vector<16x32xbf16>, vector<32x32xbf16>, vector<16x32xf32> -> vector<16x32xf32>
    %8 = arith.truncf %7 : vector<16x32xf32> to vector<16x32xbf16>
    %9 = vector.extract_strided_slice %8 {offsets = [0, 0], sizes = [16, 4], strides = [1, 1]} : vector<16x32xbf16> to vector<16x4xbf16>
    %c0_5 = arith.constant 0 : index
    %c0_6 = arith.constant 0 : index
    %10 = vector.load %arg9[%c0_5, %c0_6] : memref<8x64xbf16, #tpu.memory_space<vmem>>, vector<8x4xbf16>
    %c0_7 = arith.constant 0 : index
    %c32 = arith.constant 32 : index
    %11 = vector.load %arg9[%c0_7, %c32] : memref<8x64xbf16, #tpu.memory_space<vmem>>, vector<8x4xbf16>
    %cst_8 = arith.constant dense<0.000000e+00> : vector<16x8xf32>
    %12 = tpu.matmul %9, %10, %cst_8 {dimension_numbers = #tpu.dot_dimension_numbers<[1], [1], [0], [0], [0, 0, 1, 0], [], []>} : vector<16x4xbf16>, vector<8x4xbf16>, vector<16x8xf32> -> vector<16x8xf32>
    %cst_9 = arith.constant 5.000000e-01 : f32
    %13 = vector.broadcast %cst_9 : f32 to vector<16x8xf32>
    %14 = arith.mulf %12, %13 : vector<16x8xf32>
    %cst_10 = arith.constant dense<0xFF800000> : vector<16xf32>
    %15 = vector.multi_reduction <maximumf>, %14, %cst_10 [1] : vector<16x8xf32> to vector<16xf32>
    %16 = vector.shape_cast %15 : vector<16xf32> to vector<16x1xf32>
    %17 = vector.broadcast %16 : vector<16x1xf32> to vector<16x8xf32>
    %18 = arith.subf %14, %17 : vector<16x8xf32>
    %19 = math.exp %18 : vector<16x8xf32>
    %cst_11 = arith.constant dense<0.000000e+00> : vector<16xf32>
    %20 = vector.multi_reduction <add>, %19, %cst_11 [1] : vector<16x8xf32> to vector<16xf32>
    %21 = vector.shape_cast %20 : vector<16xf32> to vector<16x1xf32>
    %22 = tpu.reciprocal %21 {approx = true} : vector<16x1xf32> -> vector<16x1xf32>
    %23 = vector.broadcast %22 : vector<16x1xf32> to vector<16x8xf32>
    %24 = arith.mulf %19, %23 : vector<16x8xf32>
    %25 = arith.truncf %24 : vector<16x8xf32> to vector<16x8xbf16>
    %cst_12 = arith.constant dense<0.000000e+00> : vector<16x4xf32>
    %26 = tpu.matmul %25, %11, %cst_12 {dimension_numbers = #tpu.dot_dimension_numbers<[1], [0], [0], [1], [0, 0, 1, 1], [], []>} : vector<16x8xbf16>, vector<8x4xbf16>, vector<16x4xf32> -> vector<16x4xf32>
    %27 = arith.truncf %26 : vector<16x4xf32> to vector<16x4xbf16>
    %c0_13 = arith.constant 0 : index
    %c0_14 = arith.constant 0 : index
    %28 = vector.load %arg10[%c0_13, %c0_14] : memref<16x32xbf16, #tpu.memory_space<vmem>>, vector<16x4xbf16>
    tpu.vector_store %arg10[%c0_13, %c0_14], %27 {strides = array<i32>} : memref<16x32xbf16, #tpu.memory_space<vmem>>, vector<16x4xbf16>,
    %29 = vector.extract_strided_slice %8 {offsets = [0, 4], sizes = [16, 4], strides = [1, 1]} : vector<16x32xbf16> to vector<16x4xbf16>
    %c0_15 = arith.constant 0 : index
    %c4 = arith.constant 4 : index
    %30 = vector.load %arg9[%c0_15, %c4] : memref<8x64xbf16, #tpu.memory_space<vmem>>, vector<8x4xbf16>
    %c0_16 = arith.constant 0 : index
    %c36 = arith.constant 36 : index
    %31 = vector.load %arg9[%c0_16, %c36] : memref<8x64xbf16, #tpu.memory_space<vmem>>, vector<8x4xbf16>
    %cst_17 = arith.constant dense<0.000000e+00> : vector<16x8xf32>
    %32 = tpu.matmul %29, %30, %cst_17 {dimension_numbers = #tpu.dot_dimension_numbers<[1], [1], [0], [0], [0, 0, 1, 0], [], []>} : vector<16x4xbf16>, vector<8x4xbf16>, vector<16x8xf32> -> vector<16x8xf32>
    %cst_18 = arith.constant 5.000000e-01 : f32
    %33 = vector.broadcast %cst_18 : f32 to vector<16x8xf32>
    %34 = arith.mulf %32, %33 : vector<16x8xf32>
    %cst_19 = arith.constant dense<0xFF800000> : vector<16xf32>
    %35 = vector.multi_reduction <maximumf>, %34, %cst_19 [1] : vector<16x8xf32> to vector<16xf32>
    %36 = vector.shape_cast %35 : vector<16xf32> to vector<16x1xf32>
    %37 = vector.broadcast %36 : vector<16x1xf32> to vector<16x8xf32>
    %38 = arith.subf %34, %37 : vector<16x8xf32>
    %39 = math.exp %38 : vector<16x8xf32>
    %cst_20 = arith.constant dense<0.000000e+00> : vector<16xf32>
    %40 = vector.multi_reduction <add>, %39, %cst_20 [1] : vector<16x8xf32> to vector<16xf32>
    %41 = vector.shape_cast %40 : vector<16xf32> to vector<16x1xf32>
    %42 = tpu.reciprocal %41 {approx = true} : vector<16x1xf32> -> vector<16x1xf32>
    %43 = vector.broadcast %42 : vector<16x1xf32> to vector<16x8xf32>
    %44 = arith.mulf %39, %43 : vector<16x8xf32>
    %45 = arith.truncf %44 : vector<16x8xf32> to vector<16x8xbf16>
    %cst_21 = arith.constant dense<0.000000e+00> : vector<16x4xf32>
    %46 = tpu.matmul %45, %31, %cst_21 {dimension_numbers = #tpu.dot_dimension_numbers<[1], [0], [0], [1], [0, 0, 1, 1], [], []>} : vector<16x8xbf16>, vector<8x4xbf16>, vector<16x4xf32> -> vector<16x4xf32>
    %47 = arith.truncf %46 : vector<16x4xf32> to vector<16x4xbf16>
    %c0_22 = arith.constant 0 : index
    %c4_23 = arith.constant 4 : index
    %48 = vector.load %arg10[%c0_22, %c4_23] : memref<16x32xbf16, #tpu.memory_space<vmem>>, vector<16x4xbf16>
    tpu.vector_store %arg10[%c0_22, %c4_23], %47 {strides = array<i32>} : memref<16x32xbf16, #tpu.memory_space<vmem>>, vector<16x4xbf16>,
    %49 = vector.extract_strided_slice %8 {offsets = [0, 8], sizes = [16, 4], strides = [1, 1]} : vector<16x32xbf16> to vector<16x4xbf16>
    %c0_24 = arith.constant 0 : index
    %c8 = arith.constant 8 : index
    %50 = vector.load %arg9[%c0_24, %c8] : memref<8x64xbf16, #tpu.memory_space<vmem>>, vector<8x4xbf16>
    %c0_25 = arith.constant 0 : index
    %c40 = arith.constant 40 : index
    %51 = vector.load %arg9[%c0_25, %c40] : memref<8x64xbf16, #tpu.memory_space<vmem>>, vector<8x4xbf16>
    %cst_26 = arith.constant dense<0.000000e+00> : vector<16x8xf32>
    %52 = tpu.matmul %49, %50, %cst_26 {dimension_numbers = #tpu.dot_dimension_numbers<[1], [1], [0], [0], [0, 0, 1, 0], [], []>} : vector<16x4xbf16>, vector<8x4xbf16>, vector<16x8xf32> -> vector<16x8xf32>
    %cst_27 = arith.constant 5.000000e-01 : f32
    %53 = vector.broadcast %cst_27 : f32 to vector<16x8xf32>
    %54 = arith.mulf %52, %53 : vector<16x8xf32>
    %cst_28 = arith.constant dense<0xFF800000> : vector<16xf32>
    %55 = vector.multi_reduction <maximumf>, %54, %cst_28 [1] : vector<16x8xf32> to vector<16xf32>
    %56 = vector.shape_cast %55 : vector<16xf32> to vector<16x1xf32>
    %57 = vector.broadcast %56 : vector<16x1xf32> to vector<16x8xf32>
    %58 = arith.subf %54, %57 : vector<16x8xf32>
    %59 = math.exp %58 : vector<16x8xf32>
    %cst_29 = arith.constant dense<0.000000e+00> : vector<16xf32>
    %60 = vector.multi_reduction <add>, %59, %cst_29 [1] : vector<16x8xf32> to vector<16xf32>
    %61 = vector.shape_cast %60 : vector<16xf32> to vector<16x1xf32>
    %62 = tpu.reciprocal %61 {approx = true} : vector<16x1xf32> -> vector<16x1xf32>
    %63 = vector.broadcast %62 : vector<16x1xf32> to vector<16x8xf32>
    %64 = arith.mulf %59, %63 : vector<16x8xf32>
    %65 = arith.truncf %64 : vector<16x8xf32> to vector<16x8xbf16>
    %cst_30 = arith.constant dense<0.000000e+00> : vector<16x4xf32>
    %66 = tpu.matmul %65, %51, %cst_30 {dimension_numbers = #tpu.dot_dimension_numbers<[1], [0], [0], [1], [0, 0, 1, 1], [], []>} : vector<16x8xbf16>, vector<8x4xbf16>, vector<16x4xf32> -> vector<16x4xf32>
    %67 = arith.truncf %66 : vector<16x4xf32> to vector<16x4xbf16>
    %c0_31 = arith.constant 0 : index
    %c8_32 = arith.constant 8 : index
    %68 = vector.load %arg10[%c0_31, %c8_32] : memref<16x32xbf16, #tpu.memory_space<vmem>>, vector<16x4xbf16>
    tpu.vector_store %arg10[%c0_31, %c8_32], %67 {strides = array<i32>} : memref<16x32xbf16, #tpu.memory_space<vmem>>, vector<16x4xbf16>,
    %69 = vector.extract_strided_slice %8 {offsets = [0, 12], sizes = [16, 4], strides = [1, 1]} : vector<16x32xbf16> to vector<16x4xbf16>
    %c0_33 = arith.constant 0 : index
    %c12 = arith.constant 12 : index
    %70 = vector.load %arg9[%c0_33, %c12] : memref<8x64xbf16, #tpu.memory_space<vmem>>, vector<8x4xbf16>
    %c0_34 = arith.constant 0 : index
    %c44 = arith.constant 44 : index
    %71 = vector.load %arg9[%c0_34, %c44] : memref<8x64xbf16, #tpu.memory_space<vmem>>, vector<8x4xbf16>
    %cst_35 = arith.constant dense<0.000000e+00> : vector<16x8xf32>
    %72 = tpu.matmul %69, %70, %cst_35 {dimension_numbers = #tpu.dot_dimension_numbers<[1], [1], [0], [0], [0, 0, 1, 0], [], []>} : vector<16x4xbf16>, vector<8x4xbf16>, vector<16x8xf32> -> vector<16x8xf32>
    %cst_36 = arith.constant 5.000000e-01 : f32
    %73 = vector.broadcast %cst_36 : f32 to vector<16x8xf32>
    %74 = arith.mulf %72, %73 : vector<16x8xf32>
    %cst_37 = arith.constant dense<0xFF800000> : vector<16xf32>
    %75 = vector.multi_reduction <maximumf>, %74, %cst_37 [1] : vector<16x8xf32> to vector<16xf32>
    %76 = vector.shape_cast %75 : vector<16xf32> to vector<16x1xf32>
    %77 = vector.broadcast %76 : vector<16x1xf32> to vector<16x8xf32>
    %78 = arith.subf %74, %77 : vector<16x8xf32>
    %79 = math.exp %78 : vector<16x8xf32>
    %cst_38 = arith.constant dense<0.000000e+00> : vector<16xf32>
    %80 = vector.multi_reduction <add>, %79, %cst_38 [1] : vector<16x8xf32> to vector<16xf32>
    %81 = vector.shape_cast %80 : vector<16xf32> to vector<16x1xf32>
    %82 = tpu.reciprocal %81 {approx = true} : vector<16x1xf32> -> vector<16x1xf32>
    %83 = vector.broadcast %82 : vector<16x1xf32> to vector<16x8xf32>
    %84 = arith.mulf %79, %83 : vector<16x8xf32>
    %85 = arith.truncf %84 : vector<16x8xf32> to vector<16x8xbf16>
    %cst_39 = arith.constant dense<0.000000e+00> : vector<16x4xf32>
    %86 = tpu.matmul %85, %71, %cst_39 {dimension_numbers = #tpu.dot_dimension_numbers<[1], [0], [0], [1], [0, 0, 1, 1], [], []>} : vector<16x8xbf16>, vector<8x4xbf16>, vector<16x4xf32> -> vector<16x4xf32>
    %87 = arith.truncf %86 : vector<16x4xf32> to vector<16x4xbf16>
    %c0_40 = arith.constant 0 : index
    %c12_41 = arith.constant 12 : index
    %88 = vector.load %arg10[%c0_40, %c12_41] : memref<16x32xbf16, #tpu.memory_space<vmem>>, vector<16x4xbf16>
    tpu.vector_store %arg10[%c0_40, %c12_41], %87 {strides = array<i32>} : memref<16x32xbf16, #tpu.memory_space<vmem>>, vector<16x4xbf16>,
    %89 = vector.extract_strided_slice %8 {offsets = [0, 16], sizes = [16, 4], strides = [1, 1]} : vector<16x32xbf16> to vector<16x4xbf16>
    %c0_42 = arith.constant 0 : index
    %c16 = arith.constant 16 : index
    %90 = vector.load %arg9[%c0_42, %c16] : memref<8x64xbf16, #tpu.memory_space<vmem>>, vector<8x4xbf16>
    %c0_43 = arith.constant 0 : index
    %c48 = arith.constant 48 : index
    %91 = vector.load %arg9[%c0_43, %c48] : memref<8x64xbf16, #tpu.memory_space<vmem>>, vector<8x4xbf16>
    %cst_44 = arith.constant dense<0.000000e+00> : vector<16x8xf32>
    %92 = tpu.matmul %89, %90, %cst_44 {dimension_numbers = #tpu.dot_dimension_numbers<[1], [1], [0], [0], [0, 0, 1, 0], [], []>} : vector<16x4xbf16>, vector<8x4xbf16>, vector<16x8xf32> -> vector<16x8xf32>
    %cst_45 = arith.constant 5.000000e-01 : f32
    %93 = vector.broadcast %cst_45 : f32 to vector<16x8xf32>
    %94 = arith.mulf %92, %93 : vector<16x8xf32>
    %cst_46 = arith.constant dense<0xFF800000> : vector<16xf32>
    %95 = vector.multi_reduction <maximumf>, %94, %cst_46 [1] : vector<16x8xf32> to vector<16xf32>
    %96 = vector.shape_cast %95 : vector<16xf32> to vector<16x1xf32>
    %97 = vector.broadcast %96 : vector<16x1xf32> to vector<16x8xf32>
    %98 = arith.subf %94, %97 : vector<16x8xf32>
    %99 = math.exp %98 : vector<16x8xf32>
    %cst_47 = arith.constant dense<0.000000e+00> : vector<16xf32>
    %100 = vector.multi_reduction <add>, %99, %cst_47 [1] : vector<16x8xf32> to vector<16xf32>
    %101 = vector.shape_cast %100 : vector<16xf32> to vector<16x1xf32>
    %102 = tpu.reciprocal %101 {approx = true} : vector<16x1xf32> -> vector<16x1xf32>
    %103 = vector.broadcast %102 : vector<16x1xf32> to vector<16x8xf32>
    %104 = arith.mulf %99, %103 : vector<16x8xf32>
    %105 = arith.truncf %104 : vector<16x8xf32> to vector<16x8xbf16>
    %cst_48 = arith.constant dense<0.000000e+00> : vector<16x4xf32>
    %106 = tpu.matmul %105, %91, %cst_48 {dimension_numbers = #tpu.dot_dimension_numbers<[1], [0], [0], [1], [0, 0, 1, 1], [], []>} : vector<16x8xbf16>, vector<8x4xbf16>, vector<16x4xf32> -> vector<16x4xf32>
    %107 = arith.truncf %106 : vector<16x4xf32> to vector<16x4xbf16>
    %c0_49 = arith.constant 0 : index
    %c16_50 = arith.constant 16 : index
    %108 = vector.load %arg10[%c0_49, %c16_50] : memref<16x32xbf16, #tpu.memory_space<vmem>>, vector<16x4xbf16>
    tpu.vector_store %arg10[%c0_49, %c16_50], %107 {strides = array<i32>} : memref<16x32xbf16, #tpu.memory_space<vmem>>, vector<16x4xbf16>,
    %109 = vector.extract_strided_slice %8 {offsets = [0, 20], sizes = [16, 4], strides = [1, 1]} : vector<16x32xbf16> to vector<16x4xbf16>
    %c0_51 = arith.constant 0 : index
    %c20 = arith.constant 20 : index
    %110 = vector.load %arg9[%c0_51, %c20] : memref<8x64xbf16, #tpu.memory_space<vmem>>, vector<8x4xbf16>
    %c0_52 = arith.constant 0 : index
    %c52 = arith.constant 52 : index
    %111 = vector.load %arg9[%c0_52, %c52] : memref<8x64xbf16, #tpu.memory_space<vmem>>, vector<8x4xbf16>
    %cst_53 = arith.constant dense<0.000000e+00> : vector<16x8xf32>
    %112 = tpu.matmul %109, %110, %cst_53 {dimension_numbers = #tpu.dot_dimension_numbers<[1], [1], [0], [0], [0, 0, 1, 0], [], []>} : vector<16x4xbf16>, vector<8x4xbf16>, vector<16x8xf32> -> vector<16x8xf32>
    %cst_54 = arith.constant 5.000000e-01 : f32
    %113 = vector.broadcast %cst_54 : f32 to vector<16x8xf32>
    %114 = arith.mulf %112, %113 : vector<16x8xf32>
    %cst_55 = arith.constant dense<0xFF800000> : vector<16xf32>
    %115 = vector.multi_reduction <maximumf>, %114, %cst_55 [1] : vector<16x8xf32> to vector<16xf32>
    %116 = vector.shape_cast %115 : vector<16xf32> to vector<16x1xf32>
    %117 = vector.broadcast %116 : vector<16x1xf32> to vector<16x8xf32>
    %118 = arith.subf %114, %117 : vector<16x8xf32>
    %119 = math.exp %118 : vector<16x8xf32>
    %cst_56 = arith.constant dense<0.000000e+00> : vector<16xf32>
    %120 = vector.multi_reduction <add>, %119, %cst_56 [1] : vector<16x8xf32> to vector<16xf32>
    %121 = vector.shape_cast %120 : vector<16xf32> to vector<16x1xf32>
    %122 = tpu.reciprocal %121 {approx = true} : vector<16x1xf32> -> vector<16x1xf32>
    %123 = vector.broadcast %122 : vector<16x1xf32> to vector<16x8xf32>
    %124 = arith.mulf %119, %123 : vector<16x8xf32>
    %125 = arith.truncf %124 : vector<16x8xf32> to vector<16x8xbf16>
    %cst_57 = arith.constant dense<0.000000e+00> : vector<16x4xf32>
    %126 = tpu.matmul %125, %111, %cst_57 {dimension_numbers = #tpu.dot_dimension_numbers<[1], [0], [0], [1], [0, 0, 1, 1], [], []>} : vector<16x8xbf16>, vector<8x4xbf16>, vector<16x4xf32> -> vector<16x4xf32>
    %127 = arith.truncf %126 : vector<16x4xf32> to vector<16x4xbf16>
    %c0_58 = arith.constant 0 : index
    %c20_59 = arith.constant 20 : index
    %128 = vector.load %arg10[%c0_58, %c20_59] : memref<16x32xbf16, #tpu.memory_space<vmem>>, vector<16x4xbf16>
    tpu.vector_store %arg10[%c0_58, %c20_59], %127 {strides = array<i32>} : memref<16x32xbf16, #tpu.memory_space<vmem>>, vector<16x4xbf16>,
    %129 = vector.extract_strided_slice %8 {offsets = [0, 24], sizes = [16, 4], strides = [1, 1]} : vector<16x32xbf16> to vector<16x4xbf16>
    %c0_60 = arith.constant 0 : index
    %c24 = arith.constant 24 : index
    %130 = vector.load %arg9[%c0_60, %c24] : memref<8x64xbf16, #tpu.memory_space<vmem>>, vector<8x4xbf16>
    %c0_61 = arith.constant 0 : index
    %c56 = arith.constant 56 : index
    %131 = vector.load %arg9[%c0_61, %c56] : memref<8x64xbf16, #tpu.memory_space<vmem>>, vector<8x4xbf16>
    %cst_62 = arith.constant dense<0.000000e+00> : vector<16x8xf32>
    %132 = tpu.matmul %129, %130, %cst_62 {dimension_numbers = #tpu.dot_dimension_numbers<[1], [1], [0], [0], [0, 0, 1, 0], [], []>} : vector<16x4xbf16>, vector<8x4xbf16>, vector<16x8xf32> -> vector<16x8xf32>
    %cst_63 = arith.constant 5.000000e-01 : f32
    %133 = vector.broadcast %cst_63 : f32 to vector<16x8xf32>
    %134 = arith.mulf %132, %133 : vector<16x8xf32>
    %cst_64 = arith.constant dense<0xFF800000> : vector<16xf32>
    %135 = vector.multi_reduction <maximumf>, %134, %cst_64 [1] : vector<16x8xf32> to vector<16xf32>
    %136 = vector.shape_cast %135 : vector<16xf32> to vector<16x1xf32>
    %137 = vector.broadcast %136 : vector<16x1xf32> to vector<16x8xf32>
    %138 = arith.subf %134, %137 : vector<16x8xf32>
    %139 = math.exp %138 : vector<16x8xf32>
    %cst_65 = arith.constant dense<0.000000e+00> : vector<16xf32>
    %140 = vector.multi_reduction <add>, %139, %cst_65 [1] : vector<16x8xf32> to vector<16xf32>
    %141 = vector.shape_cast %140 : vector<16xf32> to vector<16x1xf32>
    %142 = tpu.reciprocal %141 {approx = true} : vector<16x1xf32> -> vector<16x1xf32>
    %143 = vector.broadcast %142 : vector<16x1xf32> to vector<16x8xf32>
    %144 = arith.mulf %139, %143 : vector<16x8xf32>
    %145 = arith.truncf %144 : vector<16x8xf32> to vector<16x8xbf16>
    %cst_66 = arith.constant dense<0.000000e+00> : vector<16x4xf32>
    %146 = tpu.matmul %145, %131, %cst_66 {dimension_numbers = #tpu.dot_dimension_numbers<[1], [0], [0], [1], [0, 0, 1, 1], [], []>} : vector<16x8xbf16>, vector<8x4xbf16>, vector<16x4xf32> -> vector<16x4xf32>
    %147 = arith.truncf %146 : vector<16x4xf32> to vector<16x4xbf16>
    %c0_67 = arith.constant 0 : index
    %c24_68 = arith.constant 24 : index
    %148 = vector.load %arg10[%c0_67, %c24_68] : memref<16x32xbf16, #tpu.memory_space<vmem>>, vector<16x4xbf16>
    tpu.vector_store %arg10[%c0_67, %c24_68], %147 {strides = array<i32>} : memref<16x32xbf16, #tpu.memory_space<vmem>>, vector<16x4xbf16>,
    %149 = vector.extract_strided_slice %8 {offsets = [0, 28], sizes = [16, 4], strides = [1, 1]} : vector<16x32xbf16> to vector<16x4xbf16>
    %c0_69 = arith.constant 0 : index
    %c28 = arith.constant 28 : index
    %150 = vector.load %arg9[%c0_69, %c28] : memref<8x64xbf16, #tpu.memory_space<vmem>>, vector<8x4xbf16>
    %c0_70 = arith.constant 0 : index
    %c60 = arith.constant 60 : index
    %151 = vector.load %arg9[%c0_70, %c60] : memref<8x64xbf16, #tpu.memory_space<vmem>>, vector<8x4xbf16>
    %cst_71 = arith.constant dense<0.000000e+00> : vector<16x8xf32>
    %152 = tpu.matmul %149, %150, %cst_71 {dimension_numbers = #tpu.dot_dimension_numbers<[1], [1], [0], [0], [0, 0, 1, 0], [], []>} : vector<16x4xbf16>, vector<8x4xbf16>, vector<16x8xf32> -> vector<16x8xf32>
    %cst_72 = arith.constant 5.000000e-01 : f32
    %153 = vector.broadcast %cst_72 : f32 to vector<16x8xf32>
    %154 = arith.mulf %152, %153 : vector<16x8xf32>
    %cst_73 = arith.constant dense<0xFF800000> : vector<16xf32>
    %155 = vector.multi_reduction <maximumf>, %154, %cst_73 [1] : vector<16x8xf32> to vector<16xf32>
    %156 = vector.shape_cast %155 : vector<16xf32> to vector<16x1xf32>
    %157 = vector.broadcast %156 : vector<16x1xf32> to vector<16x8xf32>
    %158 = arith.subf %154, %157 : vector<16x8xf32>
    %159 = math.exp %158 : vector<16x8xf32>
    %cst_74 = arith.constant dense<0.000000e+00> : vector<16xf32>
    %160 = vector.multi_reduction <add>, %159, %cst_74 [1] : vector<16x8xf32> to vector<16xf32>
    %161 = vector.shape_cast %160 : vector<16xf32> to vector<16x1xf32>
    %162 = tpu.reciprocal %161 {approx = true} : vector<16x1xf32> -> vector<16x1xf32>
    %163 = vector.broadcast %162 : vector<16x1xf32> to vector<16x8xf32>
    %164 = arith.mulf %159, %163 : vector<16x8xf32>
    %165 = arith.truncf %164 : vector<16x8xf32> to vector<16x8xbf16>
    %cst_75 = arith.constant dense<0.000000e+00> : vector<16x4xf32>
    %166 = tpu.matmul %165, %151, %cst_75 {dimension_numbers = #tpu.dot_dimension_numbers<[1], [0], [0], [1], [0, 0, 1, 1], [], []>} : vector<16x8xbf16>, vector<8x4xbf16>, vector<16x4xf32> -> vector<16x4xf32>
    %167 = arith.truncf %166 : vector<16x4xf32> to vector<16x4xbf16>
    %c0_76 = arith.constant 0 : index
    %c28_77 = arith.constant 28 : index
    %168 = vector.load %arg10[%c0_76, %c28_77] : memref<16x32xbf16, #tpu.memory_space<vmem>>, vector<16x4xbf16>
    tpu.vector_store %arg10[%c0_76, %c28_77], %167 {strides = array<i32>} : memref<16x32xbf16, #tpu.memory_space<vmem>>, vector<16x4xbf16>,
    %c0_78 = arith.constant 0 : index
    %c0_79 = arith.constant 0 : index
    %169 = vector.load %arg10[%c0_78, %c0_79] : memref<16x32xbf16, #tpu.memory_space<vmem>>, vector<16x32xbf16>
    %c0_80 = arith.constant 0 : index
    %c0_81 = arith.constant 0 : index
    %170 = vector.load %arg6[%c0_80, %c0_81] : memref<32x32xbf16, #tpu.memory_space<vmem>>, vector<32x32xbf16>
    %cst_82 = arith.constant dense<0.000000e+00> : vector<16x32xf32>
    %171 = tpu.matmul %169, %170, %cst_82 {dimension_numbers = #tpu.dot_dimension_numbers<[1], [0], [0], [1], [0, 0, 1, 1], [], []>} : vector<16x32xbf16>, vector<32x32xbf16>, vector<16x32xf32> -> vector<16x32xf32>
    %c0_83 = arith.constant 0 : index
    %c0_84 = arith.constant 0 : index
    %172 = vector.load %arg7[%c0_83, %c0_84] : memref<1x32xf32, #tpu.memory_space<vmem>>, vector<1x32xf32>
    %173 = vector.broadcast %172 : vector<1x32xf32> to vector<16x32xf32>
    %174 = arith.addf %171, %173 : vector<16x32xf32>
    %c0_85 = arith.constant 0 : index
    %c0_86 = arith.constant 0 : index
    %c0_87 = arith.constant 0 : index
    %175 = vector.load %arg8[%c0_85, %c0_86, %c0_87] : memref<1x16x32xf32, #tpu.memory_space<vmem>>, vector<1x16x32xf32>
    %176 = vector.shape_cast %175 : vector<1x16x32xf32> to vector<16x32xf32>
    %177 = vector.shape_cast %174 : vector<16x32xf32> to vector<1x16x32xf32>
    tpu.vector_store %arg8[%c0_85, %c0_86, %c0_87], %177 {strides = array<i32>} : memref<1x16x32xf32, #tpu.memory_space<vmem>>, vector<1x16x32xf32>,
    return
  }
  func.func @transform_0(%arg0: i32, %arg1: i32) -> (i32, i32, i32) {
    %c0_i32 = arith.constant 0 : i32
    %c0_i32_0 = arith.constant 0 : i32
    return %arg0, %arg1, %c0_i32 : i32, i32, i32
  }
  func.func @transform_1(%arg0: i32, %arg1: i32) -> (i32, i32, i32) {
    %c0_i32 = arith.constant 0 : i32
    %c0_i32_0 = arith.constant 0 : i32
    %c0_i32_1 = arith.constant 0 : i32
    return %arg0, %c0_i32, %c0_i32_0 : i32, i32, i32
  }
  func.func @transform_2(%arg0: i32, %arg1: i32) -> (i32, i32) {
    %c0_i32 = arith.constant 0 : i32
    %c0_i32_0 = arith.constant 0 : i32
    %c0_i32_1 = arith.constant 0 : i32
    return %c0_i32, %c0_i32_0 : i32, i32
  }
  func.func @transform_3(%arg0: i32, %arg1: i32) -> (i32, i32) {
    %c0_i32 = arith.constant 0 : i32
    %c0_i32_0 = arith.constant 0 : i32
    %c0_i32_1 = arith.constant 0 : i32
    return %c0_i32, %c0_i32_0 : i32, i32
  }
  func.func @transform_4(%arg0: i32, %arg1: i32) -> (i32, i32) {
    %c0_i32 = arith.constant 0 : i32
    %c0_i32_0 = arith.constant 0 : i32
    %c0_i32_1 = arith.constant 0 : i32
    return %c0_i32, %c0_i32_0 : i32, i32
  }
  func.func @transform_5(%arg0: i32, %arg1: i32) -> (i32, i32) {
    %c0_i32 = arith.constant 0 : i32
    %c0_i32_0 = arith.constant 0 : i32
    %c0_i32_1 = arith.constant 0 : i32
    return %c0_i32, %c0_i32_0 : i32, i32
  }
  func.func @transform_6(%arg0: i32, %arg1: i32) -> (i32, i32, i32) {
    %c0_i32 = arith.constant 0 : i32
    %c0_i32_0 = arith.constant 0 : i32
    return %arg0, %arg1, %c0_i32 : i32, i32, i32
  }
}

</mosaic_0001>

<bundles_post_ra>
// kernel: tpu_custom_call.1
= control target key start
LH: loop header
LB: loop body
LE: loop exit
PB: predicated region body
PF: predicated region fallthrough
CT: control target
= control target key end

     0   :  { %s3332_s0 = inlined_call_operand.hbm [shape: f32[2,32,32], index: 0, kind: input, shape index: {}]   ;;  %s3333_s1 = inlined_call_operand.hbm [shape: f32[2,8,32], index: 1, kind: input, shape index: {}]   ;;  %s3334_s2 = inlined_call_operand.hbm [shape: bf16[32,32], index: 2, kind: input, shape index: {}]   ;;  %s3335_s3 = inlined_call_operand.hbm [shape: bf16[32,64], index: 3, kind: input, shape index: {}]   ;;  %s3336_s4 = inlined_call_operand.hbm [shape: bf16[32,32], index: 4, kind: input, shape index: {}]   ;;  %s3337_s5 = inlined_call_operand.vmem [shape: f32[1,32], index: 5, kind: input, shape index: {}]   ;;  %s3338_s6 = inlined_call_operand.hbm [shape: f32[2,32,32], index: 6, kind: output, shape index: {}]  }
   0x1   :  { %3351 = sst [smem:[#allocation25_spill]] %s3334_s2 }
   0x2   :  { %3352 = sst [smem:[#allocation26_spill]] %s3335_s3 }
   0x3   :  { %3353 = sst [smem:[#allocation27_spill]] %s3336_s4 }
   0x4   :  { %3354 = sst [smem:[#allocation28_spill]] %s3337_s5 }
   0x5   :  { %3355 = sst [smem:[#allocation29_spill]] %s3338_s6 }
   0x6   :  { %11 = vsyncpa [#allocation5], 0 }
   0x7   :  { %13 = vsyncpa [#allocation5 + $0x1], 0 }
   0x8   :  { %14 = vsyncpa [#allocation8], 0 }
   0x9   :  { %16 = vsyncpa [#allocation8 + $0x1], 0 }
   0xa   :  { %17 = vsyncpa [#allocation11], 0 }
   0xb   :  { %18 = vsyncpa [#allocation6], 0 }
   0xc   :  { %20 = vsyncpa [#allocation6 + $0x1], 0  ;;  %s2636_s21 = smov 0   ;;  %s2638_s22 = smov 0  }
   0xd   :  { %s2640_s23 = smov 0   ;;  %s2642_s24 = smov 0  }
   0xe   :  { %s2644_s25 = smov 0   ;;  %s2646_s26 = smov 0  }
   0xf   :  { %s2648_s27 = smov 0   ;;  %s2650_s28 = smov 0  }
  0x10   :  { %s2652_s29 = smov 0   ;;  %s2654_s30 = smov 0  }
  0x11   :  { %s2656_s7 = smov 0  }
  0x12 LB: > { %3356 = sst [smem:[#allocation19_spill]] %s2534_s24  ;;  %s2692_s8 = sadd.s32 4294967295, %s2562_s7   ;;  %s2562_s7 = sphi %s2656_s7, %s26_s7   ;;  %s2558_s30 = sphi %s2654_s30, %s3407_s30   ;;  %s2554_s29 = sphi %s2652_s29, %s3406_s29   ;;  %s2550_s28 = sphi %s2650_s28, %s3405_s28   ;;  %s2546_s27 = sphi %s2648_s27, %s3404_s27   ;;  %s2542_s26 = sphi %s2646_s26, %s3403_s26   ;;  %s2538_s25 = sphi %s2644_s25, %s3402_s25   ;;  %s2534_s24 = sphi %s2642_s24, %s3401_s24   ;;  %s2530_s23 = sphi %s2640_s23, %s3400_s23   ;;  %s2526_s22 = sphi %s2638_s22, %s3399_s22   ;;  %s2522_s21 = sphi %s2636_s21, %s3398_s21  }
  0x13   : > { %3357 = sst [smem:[#allocation20_spill]] %s2546_s27  ;;  %s1816_s9 = sadd.s32 4294967294, %s2562_s7  }
  0x14   : > { %3358 = sst [smem:[#allocation21_spill]] %s2550_s28  ;;  %p60_p0 = scmp.ne.s32.totalorder %s2538_s25, %s2534_s24 }
  0x15   : > { %p3342_p1 = scmp.eq.s32.totalorder %s2692_s8, 0  ;;  %p202_p3 = scmp.eq.s32.totalorder %s1816_s9, 3 }
  0x16   : > { %p1817_p5 = scmp.ge.s32.totalorder %s2562_s7, 1  ;;  %p209_p7 = scmp.lt.s32.totalorder %s2562_s7, 5 }
  0x17   : > { %p2701_p4 = por %p3342_p1, %p60_p0  ;;  %p2706_p6 = por %p202_p3, %p60_p0 }
  0x18   : > { %p2711_p8 = pnand %p1817_p5, %p209_p7  ;;  %s2564_s13 = smov [#allocation9]  }
  0x19   : > { %s3359_s10 = scalar_select %p2701_p4, 1, 0 }
  0x1a   : > { %s3361_s11 = scalar_select %p2706_p6, 1, 0 }
  0x1b   : > { %3360 = sst [smem:[#allocation22_spill]] %s3359_s10  ;;  %s221_s14 = sshll.u32 %s2564_s13, 4  ;;  %s2715_s14 = int_to_ptr.vmem [resolvable:$true] %s221_s14 }
  0x1c   : > { %3362 = sst [smem:[#allocation23_spill]] %s3361_s11  ;;  %p2055_p9 = pneg %p2711_p8 }
  0x1d   : > { %s3363_s12 = scalar_select %p2711_p8, 1, 0 }
  0x1e   : > { %p2721_p10 = pnand %p2055_p9, %p3342_p1  ;;  %s2565_s16 = smov [#allocation10]  }
  0x1f   : > { %s234_s17 = sshll.u32 %s2565_s16, 4  ;;  %s2566_s18 = smov [#allocation12]   ;;  %s2725_s17 = int_to_ptr.vmem [resolvable:$true] %s234_s17 }
  0x20   : > { %s2727_s19 = sshll.u32 %s2566_s18, 4  ;;  %s3365_s2 = sld [smem:[#allocation25_spill]]  ;;  %s248_s19 = int_to_ptr.vmem [resolvable:$true] %s2727_s19 }
  0x21   : > { %p2737_p12 = pneg %p2721_p10 }
  0x26   : > { %s2284_s13 = scalar_lea.hbm %s3365_s2, 256 }
  0x27   : > { %p2285_p11 = scmp.ne.s32.totalorder %s3365_s2, %s2284_s13  ;;  %p2291_p3 = scmp.lt.u32.totalorder %s2284_s13, %s3365_s2 }
  0x29   : > { %p2287_p13 = pnand %p2737_p12, %p2285_p11 }
  0x2b   : > { %p2288_p0 = pneg %p2287_p13 }
  0x2d   : > { %p2293_p5 = pnand %p2291_p3, %p2288_p0 }
  0x2f   : > { %2296 = shalt.err (!%p2293_p5)
}
  0x30   : > { %s2297_s24 = scalar_lea.vmem %s2715_s14, 256  ;;  %p2305_p2 = scmp.lt.s32.totalorder %s2715_s14, %s2715_s14 }
  0x31   : > { %p2298_p7 = scmp.ne.s32.totalorder %s2715_s14, %s2297_s24  ;;  %p2306_p6 = scmp.lt.s32.totalorder %s2297_s24, %s2297_s24 }
  0x33   : > { %p2300_p9 = pnand %p2298_p7, %p2737_p12  ;;  %p2307_p11 = por %p2306_p6, %p2305_p2 }
  0x35   : > { %p2301_p1 = pneg %p2300_p9 }
  0x37   : > { %p2308_p13 = pnand %p2307_p11, %p2301_p1 }
  0x39   : > { %2311 = shalt.err (!%p2308_p13)
}
  0x3a   : > { %s2567_s11 = smov 64   ;;  %s2568_s20 = smov 4  }
  0x3b   : > { %2058 = dma.hbm_to_vmem [thread:$0]  (!%p2721_p10), %s3365_s2, 256, %s2715_s14, [#allocation8], %s2567_s11, %s2567_s11, %s2568_s20  }
  0x3c   : > { %s3367_s3 = sld [smem:[#allocation26_spill]] }
  0x42   : > { %s2312_s24 = scalar_lea.hbm %s3367_s3, 256 }
  0x43   : > { %p2313_p1 = scmp.ne.s32.totalorder %s3367_s3, %s2312_s24  ;;  %p2319_p0 = scmp.lt.u32.totalorder %s2312_s24, %s3367_s3 }
  0x45   : > { %p2315_p2 = pnand %p2313_p1, %p2737_p12 }
  0x47   : > { %p2316_p6 = pneg %p2315_p2 }
  0x49   : > { %p2321_p3 = pnand %p2319_p0, %p2316_p6 }
  0x4b   : > { %2324 = shalt.err (!%p2321_p3)
}
  0x4c   : > { %s2325_s14 = scalar_lea.vmem %s2725_s17, 256  ;;  %p2333_p11 = scmp.lt.s32.totalorder %s2725_s17, %s2725_s17 }
  0x4d   : > { %p2326_p5 = scmp.ne.s32.totalorder %s2725_s17, %s2325_s14  ;;  %p2334_p13 = scmp.lt.s32.totalorder %s2325_s14, %s2325_s14 }
  0x4f   : > { %p2328_p7 = pnand %p2326_p5, %p2737_p12  ;;  %p2335_p1 = por %p2334_p13, %p2333_p11 }
  0x51   : > { %p2329_p9 = pneg %p2328_p7 }
  0x53   : > { %p2336_p2 = pnand %p2335_p1, %p2329_p9 }
  0x55   : > { %2339 = shalt.err (!%p2336_p2)
}
  0x56   : > { %2061 = dma.hbm_to_vmem [thread:$0]  (!%p2721_p10), %s3367_s3, 256, %s2725_s17, [#allocation11], %s2567_s11, %s2567_s11, %s2568_s20  }
  0x57   : > { %s3368_s4 = sld [smem:[#allocation27_spill]] }
  0x5d   : > { %s2340_s9 = scalar_lea.hbm %s3368_s4, 256 }
  0x5e   : > { %p2341_p6 = scmp.ne.s32.totalorder %s3368_s4, %s2340_s9  ;;  %p2347_p5 = scmp.lt.u32.totalorder %s2340_s9, %s3368_s4 }
  0x60   : > { %p2343_p0 = pnand %p2341_p6, %p2737_p12 }
  0x62   : > { %p2344_p3 = pneg %p2343_p0 }
  0x64   : > { %p2349_p7 = pnand %p2347_p5, %p2344_p3 }
  0x66   : > { %2352 = shalt.err (!%p2349_p7)
}
  0x67   : > { %s2353_s14 = scalar_lea.vmem %s248_s19, 256  ;;  %p2361_p1 = scmp.lt.s32.totalorder %s248_s19, %s248_s19 }
  0x68   : > { %p2354_p9 = scmp.ne.s32.totalorder %s248_s19, %s2353_s14  ;;  %p2362_p2 = scmp.lt.s32.totalorder %s2353_s14, %s2353_s14 }
  0x6a   : > { %p2356_p11 = pnand %p2354_p9, %p2737_p12  ;;  %p2363_p4 = por %p2362_p2, %p2361_p1 }
  0x6c   : > { %p2357_p13 = pneg %p2356_p11 }
  0x6e   : > { %p2364_p8 = pnand %p2363_p4, %p2357_p13 }
  0x70   : > { %2367 = shalt.err (!%p2364_p8)
}
  0x71   : > { %2064 = dma.hbm_to_vmem [thread:$0]  (!%p2721_p10), %s3368_s4, 256, %s248_s19, [#allocation11], %s2567_s11, %s2567_s11, %s2568_s20  }
  0x72   : > { %s35_s6 = sadd.s32 1, %s2554_s29  ;;  %s38_s15 = sadd.s32 1, %s2558_s30 }
  0x73   : > { %p36_p4 = scmp.ge.s32.totalorder %s35_s6, 2  ;;  %s47_s27 = sadd.s32 1, %s2542_s26 }
  0x74   : > { %p54_p8 = scmp.ne.s32.totalorder %s2542_s26, %s2538_s25  ;;  %p3349_p12 = scmp.eq.s32.totalorder %s2562_s7, 0 }
  0x75   : > { %s3409_s6 = smov (%p36_p4, %s35_s6), 0  ;;  %s3411_s15 = smov (!%p36_p4, %s38_s15), %s2558_s30 }
  0x76   : > { %s43_s28 = ssub.s32 %s2554_s29, %s3409_s6  ;;  %p40_p6 = scmp.ge.s32.totalorder %s3411_s15, 2 }
  0x77   : > { %p3369_p0 = scmp.eq.s32.totalorder %s2692_s8, 3  ;;  %p2828_p10 = por %p3349_p12, %p54_p8 }
  0x78   : > { %p3348_p5 = scmp.lt.s32.totalorder %s2562_s7, 4  ;;  %s3413_s15 = smov (%p40_p6, %s3411_s15), 0 }
  0x79   : > { %p2822_p3 = por %p3369_p0, %p54_p8  ;;  %3372 = sst [smem:[#allocation24_spill]] %s3413_s15 }
  0x7a   : > { %s264_s11 = sand.u32 1, %s2542_s26   ;;  %s1823_s20 = sshll.u32 %s2554_s29, 1 }
  0x7b   : > { %s3370_s10 = scalar_select %p2822_p3, 1, 0 }
  0x7c   : > { %s2839_s9 = ssub.s32 %s2558_s30, %s3413_s15  ;;  %s1822_s16 = sshll.u32 %s264_s11, 4 }
  0x7d   : > { %s44_s13 = sor.u32 %s43_s28, %s2839_s9  ;;  %s1824_s18 = sshll.u32 %s2558_s30, 2 }
  0x7e   : > { %p45_p9 = scmp.eq.s32.totalorder %s44_s13, 0  ;;  %s274_s14 = sadd.s32 %s1824_s18, %s1823_s20 }
  0x7f   : > { %s268_s17 = scalar_lea.vmem [#allocation4], %s1822_s16  ;;  %s1825_s2 = sshll.u32 %s274_s14, 7 }
  0x80   : > { %s2845_s24 = scalar_select %p45_p9, %s2542_s26, %s47_s27  }
  0x81   : > { %s277_s5 = sshll.u32 %s268_s17, 4  ;;  %s2852_s15 = scalar_lea.hbm %s3332_s0, %s1825_s2  ;;  %s2847_s5 = int_to_ptr.vmem [resolvable:$true] %s277_s5 }
  0x82   : > { %p2858_p11 = pnand %p3348_p5, %p2828_p10  ;;  %s2862_s28 = scalar_lea.sflag [#allocation5], %s264_s11 }
  0x83   : > { %s2368_s20 = scalar_lea.hbm %s2852_s15, 256  ;;  %s2373_s4 = scalar_lea.hbm %s3332_s0, 1024 }
  0x84   : > { %p2369_p13 = scmp.ne.s32.totalorder %s2852_s15, %s2368_s20  ;;  %p2370_p1 = pneg %p2858_p11 }
  0x85   : > { %p2374_p8 = scmp.lt.u32.totalorder %s2852_s15, %s3332_s0  ;;  %p2375_p6 = scmp.lt.u32.totalorder %s2373_s4, %s2368_s20 }
  0x86   : > { %p2371_p2 = pnand %p2370_p1, %p2369_p13  ;;  %p2377_p10 = scmp.lt.u32.totalorder %s2368_s20, %s2852_s15 }
  0x87   : > { %p2376_p0 = por %p2375_p6, %p2374_p8 }
  0x88   : > { %p2372_p4 = pneg %p2371_p2 }
  0x89   : > { %p2378_p9 = por %p2377_p10, %p2376_p0 }
  0x8b   : > { %p2379_p5 = pnand %p2378_p9, %p2372_p4 }
  0x8d   : > { %2382 = shalt.err (!%p2379_p5)
}
  0x8e   : > { %s2383_s11 = scalar_lea.vmem %s2847_s5, 256  ;;  %s2569_s16 = smov [#allocation4]  }
  0x8f   : > { %p2384_p13 = scmp.ne.s32.totalorder %s2847_s5, %s2383_s11  ;;  %s2388_s18 = sshll.u32 %s2569_s16, 4  ;;  %s2389_s18 = int_to_ptr.vmem [resolvable:$false] %s2388_s18 }
  0x90   : > { %s2390_s14 = scalar_lea.vmem %s2389_s18, 512  ;;  %p2391_p7 = scmp.lt.s32.totalorder %s2847_s5, %s2389_s18 }
  0x91   : > { %p2386_p2 = pnand %p2384_p13, %p2370_p1  ;;  %p2392_p8 = scmp.lt.s32.totalorder %s2390_s14, %s2383_s11 }
  0x93   : > { %p2387_p12 = pneg %p2386_p2  ;;  %p2393_p6 = por %p2392_p8, %p2391_p7 }
  0x95   : > { %p2394_p0 = pnand %p2393_p6, %p2387_p12 }
  0x97   : > { %2397 = shalt.err (!%p2394_p0)
}
  0x98   : > { %s2570_s17 = smov 128   ;;  %s2571_s20 = smov 8  }
  0x99   : > { %2068 = dma.hbm_to_vmem [thread:$0]  (!%p2858_p11), %s2852_s15, 256, %s2847_s5, %s2862_s28, %s2570_s17, %s2570_s17, %s2571_s20  }
  0x9a   : > { %s73_s2 = sadd.s32 1, %s2530_s23  ;;  %p3374_p12 = scmp.eq.s32.totalorder %s2839_s9, 0 }
  0x9b   : > { %p80_p5 = scmp.ne.s32.totalorder %s2530_s23, %s2526_s22  ;;  %p86_p7 = scmp.ne.s32.totalorder %s2526_s22, %s2522_s21 }
  0x9c   : > { %s2894_s3 = scalar_select %p3374_p12, %s2530_s23, %s73_s2  }
  0x9d   : > { %s287_s4 = sand.u32 1, %s2562_s7   ;;  %s289_s19 = sand.u32 1, %s2530_s23  }
  0x9e   : > { %p3375_p1 = scmp.eq.s32.totalorder %s2562_s7, 0  ;;  %p3376_p10 = scmp.eq.s32.totalorder %s2692_s8, 0 }
  0x9f   : > { %s1826_s11 = sshll.u32 %s289_s19, 3  ;;  %s1827_s16 = sshll.u32 %s2558_s30, 7 }
  0xa0   : > { %p82_p4 = por %p80_p5, %p3375_p1  ;;  %p2906_p9 = por %p86_p7, %p3376_p10 }
  0xa1   : > { %s2914_s15 = scalar_lea.hbm %s3333_s1, %s1827_s16  ;;  %s291_s21 = scalar_lea.vmem [#allocation7], %s1826_s11 }
  0xa2   : > { %s298_s9 = sshll.u32 %s291_s21, 4  ;;  %p3378_p11 = scmp.lt.s32.totalorder %s2562_s7, 4  ;;  %s2916_s9 = int_to_ptr.vmem [resolvable:$true] %s298_s9 }
  0xa3   : > { %s288_s28 = scalar_lea.sflag [#allocation8], %s287_s4  ;;  %s2398_s14 = scalar_lea.hbm %s2914_s15, 128 }
  0xa4   : > { %p2920_p13 = pnand %p3378_p11, %p82_p4  ;;  %p2399_p2 = scmp.ne.s32.totalorder %s2914_s15, %s2398_s14 }
  0xa5   : > { %s2403_s2 = scalar_lea.hbm %s3333_s1, 256  ;;  %p2404_p12 = scmp.lt.u32.totalorder %s2914_s15, %s3333_s1 }
  0xa6   : > { %p2400_p8 = pneg %p2920_p13  ;;  %p2405_p5 = scmp.lt.u32.totalorder %s2403_s2, %s2398_s14 }
  0xa7   : > { %p2407_p1 = scmp.lt.u32.totalorder %s2398_s14, %s2914_s15 }
  0xa8   : > { %p2401_p6 = pnand %p2400_p8, %p2399_p2  ;;  %p2406_p7 = por %p2405_p5, %p2404_p12 }
  0xaa   : > { %p2402_p0 = pneg %p2401_p6  ;;  %p2408_p4 = por %p2407_p1, %p2406_p7 }
  0xac   : > { %p2409_p10 = pnand %p2408_p4, %p2402_p0 }
  0xae   : > { %2412 = shalt.err (!%p2409_p10)
}
  0xaf   : > { %s2413_s4 = scalar_lea.vmem %s2916_s9, 128  ;;  %s2572_s16 = smov [#allocation7]  }
  0xb0   : > { %p2414_p11 = scmp.ne.s32.totalorder %s2916_s9, %s2413_s4  ;;  %s2418_s27 = sshll.u32 %s2572_s16, 4  ;;  %s2419_s27 = int_to_ptr.vmem [resolvable:$false] %s2418_s27 }
  0xb1   : > { %s2420_s18 = scalar_lea.vmem %s2419_s27, 256  ;;  %p2421_p3 = scmp.lt.s32.totalorder %s2916_s9, %s2419_s27 }
  0xb2   : > { %p2416_p2 = pnand %p2414_p11, %p2400_p8  ;;  %p2422_p12 = scmp.lt.s32.totalorder %s2420_s18, %s2413_s4 }
  0xb4   : > { %p2417_p6 = pneg %p2416_p2  ;;  %p2423_p5 = por %p2422_p12, %p2421_p3 }
  0xb6   : > { %p2424_p7 = pnand %p2423_p5, %p2417_p6 }
  0xb8   : > { %2427 = shalt.err (!%p2424_p7)
}
  0xb9   : > { %2071 = dma.hbm_to_vmem [thread:$0]  (!%p2920_p13), %s2914_s15, 128, %s2916_s9, %s288_s28  }
  0xba   : > { %p3380_p0 = scmp.ne.s32.totalorder %s3363_s12, 0 }
  0xbb   : > { %s3381_s21 = sld [smem:[#allocation22_spill]] (!%p3380_p0)  ;;  %s2952_s14 = sand.u32 (!%p3380_p0), 1, %s2538_s25  }
  0xbc   : > { %307 = sbr.rel (%p3380_p0) target bundleno = 1963 (0x7ab), region = 44  ;;  %s1829_s17 = sshll.u32 (!%p3380_p0), %s2952_s14, 4 }
  0xbd   : > { %s310_s20 = scalar_lea.sflag (!%p3380_p0), [#allocation5], %s2952_s14  ;;  %s2956_s2 = scalar_lea.vmem (!%p3380_p0), [#allocation4], %s1829_s17 }
  0xc1   : > { %p3382_p3 = scmp.ne.s32.totalorder (!%p3380_p0), %s3381_s21, 0 }
  0xc3   : > { %2501 = dma.done.wait (%p3382_p3), %s310_s20, 256  }
  0xc4   : > { %2503 = vsyncadd (%p3382_p3), %s310_s20, 4294967040  ;;  %s318_s12 = sand.u32 1, %s2692_s8   ;;  %s320_s15 = sand.u32 1, %s2526_s22  }
  0xc5   : > { %s1830_s9 = sshll.u32 %s320_s15, 3  ;;  %s319_s5 = scalar_lea.sflag [#allocation8], %s318_s12 }
  0xc6   : > { %s322_s28 = scalar_lea.vmem [#allocation7], %s1830_s9 }
  0xc7   : > { %2505 = dma.done.wait (%p2906_p9), %s319_s5, 128  }
  0xc8   : > { %2507 = vsyncadd (%p2906_p9), %s319_s5, 4294967168  ;;  %p3383_p13 = scmp.eq.s32.totalorder %s2692_s8, 0 }
  0xca   : > { %2509 = dma.done.wait (%p3383_p13), [#allocation8], 256   ;;  %p3384_p8 = pmov %p3383_p13 }
  0xcc   : > { %2511 = vsyncadd (%p3384_p8), [#allocation8], 4294967040  ;;  %p3385_p1 = pmov %p3384_p8 }
  0xce   : > { %2513 = dma.done.wait (%p3385_p1), [#allocation11], 512   ;;  %p3386_p4 = pmov %p3385_p1 }
  0xcf   : > { %s2976_s19 = scalar_lea.vmem [#allocation13], %s1829_s17  ;;  %s3387_s11 = sld [smem:[#allocation20_spill]] }
  0xd0   : > { %2515 = vsyncadd (%p3386_p4), [#allocation11], 4294966784 }
  0xd5   : > { %p1835_p10 = scmp.ne.s32.totalorder %s3387_s11, 0 }
  0xd6   : > { %v2206_v0 = vld [vmem:[#allocation10] sm:$0xff] (!%p1835_p10)   ;;  %v2573_v1 = vmov (!%p1835_p10), 0.0   ;;  %v2207_v2 = vld [vmem:[#allocation10 + $0x8] sm:$0xff] (!%p1835_p10)   ;;  %vm2574_vm0 = vmmov (!%p1835_p10), 0   ;;  %vm393_vm1 = vcmask (!%p1835_p10), 261120   ;;  %vm438_vm2 = vcmask (!%p1835_p10), 519168  }
  0xd7   : > { %374 = sbr.rel (%p1835_p10) target bundleno = 438 (0x1b6), region = 68  ;;  %1917 = vmatprep.subr.bf16.mxu0 (!%p1835_p10), %v2573_v1  ;;  %1921 = vmatprep.mubr.msk.bf16.mxu0 (!%p1835_p10), %vm2574_vm0, %v2573_v1  ;;  %v375_v3 = vld [vmem:[%s322_s28] sm:$0xff] (!%p1835_p10) }
  0xd8   : > { %1918 = vmatpush3.bf16.msra.mxu0 (!%p1835_p10), %v2206_v0  ;;  %v376_v4 = vpack.c.bf16 (!%p1835_p10), %v375_v3, %v375_v3 }
  0xd9   : > { %1919 = vmatprep.subr.bf16.mxu0 (!%p1835_p10), %v2573_v1 }
  0xdc   : > { %1920 = vmatpush3.bf16.msra.mxu0 (!%p1835_p10), %v2207_v2 }
  0xdf   : > { %1922 = vmatmul.mubr.msk.bf16.vlgmr.msra.gmra.mrb[0].mxu0 %vm393_vm1, %v376_v4 }
 0x1b2   : > { %v431_v5 = vpop.f32.mrb[0].mxu0 }
 0x1b3   : > { %v437_v6 = vpack.c.bf16 %v431_v5, %v431_v5  ;;  %v1923_v7 = vpop.f32.mrb[1].mxu0 }
 0x1b4   : > { %v434_v8 = vpop.f32.mrb[2].mxu0 }
 0x1b5   : > { %439 = vst.msk [vmem:[#allocation2] sm:$0xf] %vm438_vm2, %v437_v6  ;;  %v1924_v9 = vpop.f32.mrb[3].mxu0 }
 0x1b6 PF: > { %v2208_v10 = vld [vmem:[#allocation9] sm:$0xff]   ;;  %v2575_v11 = vmov 0.0   ;;  %v2209_v12 = vld [vmem:[#allocation9 + $0x8] sm:$0xff]   ;;  %vm2576_vm3 = vmmov 0   ;;  %vm506_vm4 = vcmask 31744   ;;  %vm459_vm5 = vcmask 261120  }
 0x1b7   : > { %1925 = vmatprep.subr.bf16.mxu0 %v2575_v11  ;;  %1933 = vmatprep.subr.bf16.mxu1 %v2575_v11  ;;  %v440_v13 = vld [vmem:[%s2956_s2] sm:$0xff]  ;;  %v441_v14 = vld [vmem:[%s2956_s2 + $0x8] sm:$0xff]  ;;  %s2577_s8 = smov 124   ;;  %s2578_s13 = smov 120   ;;  %vm588_vm6 = vcmask 1043456   ;;  %vm556_vm7 = vcmask 64512  }
 0x1b8   : > { %1926 = vmatpush3.bf16.msra.mxu0 %v2208_v10  ;;  %1929 = vmatprep.mubr.msk.bf16.mxu0 %vm2576_vm3, %v2575_v11  ;;  %v442_v18 = vpack.c.bf16 %v441_v14, %v440_v13  ;;  %s2579_s4 = smov 116   ;;  %s2580_s16 = smov 112   ;;  %vm770_vm8 = vcmask 64544   ;;  %vm906_vm9 = vcmask 97344   ;;  %vm1042_vm10 = vcmask 130144  }
 0x1b9   : > { %1927 = vmatprep.subr.bf16.mxu0 %v2575_v11  ;;  %1935 = vmatprep.mubr.msk.bf16.mxu1 %vm2576_vm3, %v2575_v11  ;;  %s2581_s27 = smov 108   ;;  %s2582_s18 = smov 104   ;;  %vm1178_vm11 = vcmask 162944   ;;  %vm1314_vm12 = vcmask 195744   ;;  %vm1450_vm13 = vcmask 228544   ;;  %vm1586_vm14 = vcmask 261344  }
 0x1ba   : > { %s2583_s21 = smov 100   ;;  %s2584_s17 = smov 96  }
 0x1bb   : > { %s2585_s20 = smov 88   ;;  %s2586_s2 = smov 92  }
 0x1bc   : > { %v2986_v15 = vld [vmem:[#allocation2] ss:$0 sps:$4 sm:$0xff]   ;;  %1928 = vmatpush3.bf16.msra.mxu0 %v2209_v12  ;;  %s2587_s12 = smov 84   ;;  %s2588_s15 = smov 80  }
 0x1bd   : > { %v505_v16 = vld [vmem:[#allocation2] sm:$0xf]  ;;  %642 = vrot.lane.b32.xlu0 %v2986_v15, %s2577_s8  ;;  %1939 = vmatprep.subr.bf16.mxu0 %v2575_v11  ;;  %s2589_s9 = smov 76   ;;  %s2590_s5 = smov 72  }
 0x1be   : > { %v511_v17 = vsel %vm506_vm4, %v505_v16, 0  ;;  %v2997_v19 = vld [vmem:[#allocation2] ss:$0 sps:$4 sm:$0xff]   ;;  %v1843_v32 = vcombine.low %v505_v16, %v505_v16  ;;  %s2591_s28 = smov 68   ;;  %s2592_s11 = smov 4  }
 0x1bf   : > { %1934 = vmatpush3.bf16.xpose.msra.mxu1 %v511_v17  ;;  %1930 = vmatmul.mubr.msk.bf16.vlgmr.msra.gmra.mrb[0].mxu0 %vm459_vm5, %v442_v18  ;;  %v3001_v27 = vld [vmem:[#allocation2] ss:$0 sps:$4 sm:$0xff]   ;;  %p3392_p11 = scmp.ne.s32.totalorder %s3370_s10, 0 }
 0x1c0   : > { %1945 = vmatprep.subr.bf16.mxu1 %v2575_v11  ;;  %1941 = vmatprep.mubr.msk.bf16.mxu0 %vm2576_vm3, %v2575_v11  ;;  %v3008_v28 = vld [vmem:[#allocation2] ss:$0 sps:$4 sm:$0xff]  }
 0x1c1   : > { %778 = vrot.lane.b32.xlu1 %v2997_v19, %s2578_s13  ;;  %v3011_v29 = vld [vmem:[#allocation2] ss:$0 sps:$4 sm:$0xff]  }
 0x1c2   : > { %v3014_v30 = vld [vmem:[#allocation2] ss:$0 sps:$4 sm:$0xff]  }
 0x1c3   : > { %v3017_v31 = vld [vmem:[#allocation2] ss:$0 sps:$4 sm:$0xff]  }
 0x22f   : > { %v643_v22 = vpop.permute.xlu0 %642 }
 0x230   : > { %v648_v26 = vsel %vm506_vm4, %v643_v22, 0 }
 0x233   : > { %v779_v33 = vpop.permute.xlu1 %778 }
 0x234   : > { %v784_v34 = vsel %vm506_vm4, %v779_v33, 0 }
 0x292   : > { %v497_v20 = vpop.f32.mrb[0].mxu0 }
 0x293   : > { %v1931_v21 = vpop.f32.mrb[1].mxu0 }
 0x294   : > { %v500_v23 = vpop.f32.mrb[2].mxu0 }
 0x295   : > { %v504_v24 = vpack.c.bf16 %v500_v23, %v497_v20  ;;  %v1932_v25 = vpop.f32.mrb[3].mxu0 }
 0x297   : > { %773 = vrot.lane.b32.xlu1 %v504_v24, %s2578_s13  ;;  %637 = vrot.lane.b32.xlu0 %v504_v24, %s2577_s8  ;;  %s2593_s8 = smov 8   ;;  %s2594_s13 = smov 12  }
 0x298   : > { %1936 = vmatmul.mubr.msk.bf16.vlgmr.msra.gmra.mrb[0].mxu1 %vm506_vm4, %v504_v24 }
 0x299   : > { %1946 = vmatpush3.bf16.xpose.msra.mxu1 %v648_v26  ;;  %1947 = vmatprep.mubr.msk.bf16.mxu1 %vm2576_vm3, %v2575_v11 }
 0x29a   : > { %1957 = vmatprep.subr.bf16.mxu1 %v2575_v11 }
 0x29b   : > { %909 = vrot.lane.b32.xlu1 %v504_v24, %s2579_s4  ;;  %914 = vrot.lane.b32.xlu0 %v3001_v27, %s2579_s4  ;;  %s2595_s4 = smov 16  }
 0x29f   : > { %1045 = vrot.lane.b32.xlu1 %v504_v24, %s2580_s16  ;;  %1050 = vrot.lane.b32.xlu0 %v3008_v28, %s2580_s16  ;;  %s2596_s16 = smov 20  }
 0x2a3   : > { %1181 = vrot.lane.b32.xlu1 %v504_v24, %s2581_s27  ;;  %1186 = vrot.lane.b32.xlu0 %v3011_v29, %s2581_s27  ;;  %s2597_s27 = smov 24  }
 0x2a7   : > { %1317 = vrot.lane.b32.xlu1 %v504_v24, %s2582_s18  ;;  %1322 = vrot.lane.b32.xlu0 %v3014_v30, %s2582_s18  ;;  %s2598_s18 = smov 28  }
 0x2ab   : > { %1453 = vrot.lane.b32.xlu1 %v504_v24, %s2583_s21  ;;  %1458 = vrot.lane.b32.xlu0 %v3017_v31, %s2583_s21  ;;  %s3388_s21 = sld [smem:[#allocation20_spill]] }
 0x2af   : > { %583 = vrot.lane.b32.xlu1 %v1843_v32, %s2584_s17  ;;  %s3389_s17 = sld [smem:[#allocation21_spill]] }
 0x309   : > { %v638_v35 = vpop.permute.xlu0 %637  ;;  %v774_v38 = vpop.permute.xlu1 %773 }
 0x30a   : > { %1948 = vmatmul.mubr.msk.bf16.vlgmr.msra.gmra.mrb[4].mxu1 %vm506_vm4, %v638_v35 }
 0x30b   : > { %1958 = vmatpush3.bf16.xpose.msra.mxu1 %v784_v34  ;;  %1959 = vmatprep.mubr.msk.bf16.mxu1 %vm2576_vm3, %v2575_v11 }
 0x30c   : > { %1969 = vmatprep.subr.bf16.mxu1 %v2575_v11 }
 0x30d   : > { %v915_v36 = vpop.permute.xlu0 %914  ;;  %v910_v41 = vpop.permute.xlu1 %909 }
 0x30e   : > { %v920_v37 = vsel %vm506_vm4, %v915_v36, 0 }
 0x311   : > { %v1051_v39 = vpop.permute.xlu0 %1050  ;;  %v1046_v44 = vpop.permute.xlu1 %1045 }
 0x312   : > { %1960 = vmatmul.mubr.msk.bf16.vlgmr.msra.gmra.mrb[8].mxu1 %vm506_vm4, %v774_v38  ;;  %v1056_v40 = vsel %vm506_vm4, %v1051_v39, 0 }
 0x313   : > { %1970 = vmatpush3.bf16.xpose.msra.mxu1 %v920_v37  ;;  %1971 = vmatprep.mubr.msk.bf16.mxu1 %vm2576_vm3, %v2575_v11 }
 0x314   : > { %1981 = vmatprep.subr.bf16.mxu1 %v2575_v11 }
 0x315   : > { %v1187_v42 = vpop.permute.xlu0 %1186  ;;  %v1182_v47 = vpop.permute.xlu1 %1181 }
 0x316   : > { %v1192_v43 = vsel %vm506_vm4, %v1187_v42, 0 }
 0x319   : > { %v1323_v45 = vpop.permute.xlu0 %1322  ;;  %v1318_v50 = vpop.permute.xlu1 %1317 }
 0x31a   : > { %1972 = vmatmul.mubr.msk.bf16.vlgmr.msra.gmra.mrb[12].mxu1 %vm506_vm4, %v910_v41  ;;  %v1328_v46 = vsel %vm506_vm4, %v1323_v45, 0 }
 0x31b   : > { %1982 = vmatpush3.bf16.xpose.msra.mxu1 %v1056_v40  ;;  %1983 = vmatprep.mubr.msk.bf16.mxu1 %vm2576_vm3, %v2575_v11 }
 0x31c   : > { %1993 = vmatprep.subr.bf16.mxu1 %v2575_v11 }
 0x31d   : > { %v1459_v48 = vpop.permute.xlu0 %1458  ;;  %v1454_v51 = vpop.permute.xlu1 %1453 }
 0x31e   : > { %v1464_v49 = vsel %vm506_vm4, %v1459_v48, 0 }
 0x321   : > { %v584_v52 = vpop.permute.xlu1 %583 }
 0x322   : > { %1984 = vmatmul.mubr.msk.bf16.vlgmr.msra.gmra.mrb[16].mxu1 %vm506_vm4, %v1046_v44  ;;  %v590_v53 = vsel %vm588_vm6, %v584_v52, 0 }
 0x323   : > { %1994 = vmatpush3.bf16.xpose.msra.mxu1 %v1192_v43  ;;  %1995 = vmatprep.mubr.msk.bf16.mxu1 %vm2576_vm3, %v2575_v11 }
 0x324   : > { %2005 = vmatprep.subr.bf16.mxu1 %v2575_v11  ;;  %1940 = vmatpush3.bf16.msra.mxu0 %v590_v53 }
 0x325   : > { %1951 = vmatprep.subr.bf16.mxu0 %v2575_v11 }
 0x32a   : > { %1996 = vmatmul.mubr.msk.bf16.vlgmr.msra.gmra.mrb[20].mxu1 %vm506_vm4, %v1182_v47 }
 0x32b   : > { %2006 = vmatpush3.bf16.xpose.msra.mxu1 %v1328_v46  ;;  %2007 = vmatprep.mubr.msk.bf16.mxu1 %vm2576_vm3, %v2575_v11 }
 0x32c   : > { %2017 = vmatprep.subr.bf16.mxu1 %v2575_v11 }
 0x332   : > { %2008 = vmatmul.mubr.msk.bf16.vlgmr.msra.gmra.mrb[24].mxu1 %vm506_vm4, %v1318_v50 }
 0x333   : > { %2018 = vmatpush3.bf16.xpose.msra.mxu1 %v1464_v49  ;;  %2019 = vmatprep.mubr.msk.bf16.mxu1 %vm2576_vm3, %v2575_v11 }
 0x334   : > { %2029 = vmatprep.subr.bf16.mxu1 %v2575_v11 }
 0x33a   : > { %2020 = vmatmul.mubr.msk.bf16.vlgmr.msra.gmra.mrb[28].mxu1 %vm506_vm4, %v1454_v51 }
 0x33b   : > { %2033 = vmatprep.mubr.msk.bf16.mxu1 %vm2576_vm3, %v2575_v11 }
 0x36b   : > { %v547_v54 = vpop.f32.mrb[0].mxu1 }
 0x36c   : > { %v554_v55 = vmul.f32 0.5, %v547_v54  ;;  %v1937_v56 = vpop.f32.mrb[1].mxu1 }
 0x36d   : > { %v550_v57 = vpop.f32.mrb[2].mxu1 }
 0x36e   : > { %v555_v58 = vmul.f32 0.5, %v550_v57  ;;  %v1938_v59 = vpop.f32.mrb[3].mxu1  ;;  %v557_v60 = vsel %vm556_vm7, %v554_v55, -inf }
 0x36f   : > { %558 = vmax.xlane.f32.xlu0 %v557_v60 }
 0x370   : > { %v560_v61 = vsel %vm556_vm7, %v555_v58, -inf }
 0x371   : > { %561 = vmax.xlane.f32.xlu1 %v560_v61 }
 0x3dd   : > { %v684_v62 = vpop.f32.mrb[4].mxu1 }
 0x3de   : > { %v3057_v63 = vmul.f32 0.5, %v684_v62  ;;  %v1949_v0 = vpop.f32.mrb[5].mxu1 }
 0x3df   : > { %v687_v1 = vpop.f32.mrb[6].mxu1 }
 0x3e0   : > { %v3059_v2 = vmul.f32 0.5, %v687_v1  ;;  %v1950_v3 = vpop.f32.mrb[7].mxu1  ;;  %v693_v4 = vsel %vm556_vm7, %v3057_v63, -inf }
 0x3e1   : > { %694 = vmax.xlane.f32.xlu0 %v693_v4 }
 0x3e2   : > { %v696_v5 = vsel %vm556_vm7, %v3059_v2, -inf }
 0x3e5   : > { %697 = vmax.xlane.f32.xlu0 %v696_v5  ;;  %v820_v6 = vpop.f32.mrb[8].mxu1 }
 0x3e6   : > { %v3065_v7 = vmul.f32 0.5, %v820_v6  ;;  %v1961_v8 = vpop.f32.mrb[9].mxu1 }
 0x3e7   : > { %v823_v9 = vpop.f32.mrb[10].mxu1 }
 0x3e8   : > { %v3067_v10 = vmul.f32 0.5, %v823_v9  ;;  %v1962_v12 = vpop.f32.mrb[11].mxu1  ;;  %v829_v13 = vsel %vm556_vm7, %v3065_v7, -inf }
 0x3e9   : > { %830 = vmax.xlane.f32.xlu1 %v829_v13 }
 0x3ea   : > { %v832_v14 = vsel %vm556_vm7, %v3067_v10, -inf }
 0x3eb   : > { %833 = vmax.xlane.f32.xlu0 %v832_v14 }
 0x3ed   : > { %v956_v16 = vpop.f32.mrb[12].mxu1 }
 0x3ee   : > { %v3073_v17 = vmul.f32 0.5, %v956_v16  ;;  %v1973_v18 = vpop.f32.mrb[13].mxu1 }
 0x3ef   : > { %v959_v20 = vpop.f32.mrb[14].mxu1 }
 0x3f0   : > { %v3075_v21 = vmul.f32 0.5, %v959_v20  ;;  %v1974_v22 = vpop.f32.mrb[15].mxu1  ;;  %v965_v23 = vsel %vm556_vm7, %v3073_v17, -inf }
 0x3f1   : > { %966 = vmax.xlane.f32.xlu1 %v965_v23 }
 0x3f2   : > { %v968_v24 = vsel %vm556_vm7, %v3075_v21, -inf }
 0x3f3   : > { %969 = vmax.xlane.f32.xlu0 %v968_v24 }
 0x3f5   : > { %v1092_v25 = vpop.f32.mrb[16].mxu1 }
 0x3f6   : > { %v3081_v26 = vmul.f32 0.5, %v1092_v25  ;;  %v1985_v32 = vpop.f32.mrb[17].mxu1 }
 0x3f7   : > { %v1095_v33 = vpop.f32.mrb[18].mxu1 }
 0x3f8   : > { %v3083_v34 = vmul.f32 0.5, %v1095_v33  ;;  %v1986_v35 = vpop.f32.mrb[19].mxu1  ;;  %v1101_v36 = vsel %vm556_vm7, %v3081_v26, -inf }
 0x3f9   : > { %1102 = vmax.xlane.f32.xlu1 %v1101_v36 }
 0x3fa   : > { %v1104_v37 = vsel %vm556_vm7, %v3083_v34, -inf }
 0x3fb   : > { %1105 = vmax.xlane.f32.xlu0 %v1104_v37 }
 0x3fc   : > { %v559_v38 = vpop.xlane.xlu0 %558 }
 0x3fd   : > { %v563_v39 = vsub.f32 %v554_v55, %v559_v38  ;;  %v1228_v40 = vpop.f32.mrb[20].mxu1 }
 0x3fe   : > { %v562_v41 = vpop.xlane.xlu1 %561  ;;  %v3089_v42 = vmul.f32 0.5, %v1228_v40  ;;  %v1997_v43 = vpop.f32.mrb[21].mxu1 }
 0x3ff   : > { %v565_v44 = vmul.f32 1.442695, %v563_v39  ;;  %v564_v45 = vsub.f32 %v555_v58, %v562_v41  ;;  %v1231_v46 = vpop.f32.mrb[22].mxu1 }
 0x400   : > { %v3091_v47 = vmul.f32 0.5, %v1231_v46  ;;  %v1998_v48 = vpop.f32.mrb[23].mxu1  ;;  %v1237_v49 = vsel %vm556_vm7, %v3089_v42, -inf }
 0x401   : > { %2220 = vpow2.f32 %v565_v44  ;;  %v567_v50 = vmul.f32 1.442695, %v564_v45  ;;  %1238 = vmax.xlane.f32.xlu1 %v1237_v49 }
 0x402   : > { %v1240_v51 = vsel %vm556_vm7, %v3091_v47, -inf }
 0x403   : > { %2222 = vpow2.f32 %v567_v50  ;;  %1241 = vmax.xlane.f32.xlu0 %v1240_v51 }
 0x405   : > { %v1364_v52 = vpop.f32.mrb[24].mxu1 }
 0x406   : > { %v3097_v53 = vmul.f32 0.5, %v1364_v52  ;;  %v2009_v54 = vpop.f32.mrb[25].mxu1 }
 0x407   : > { %v1367_v55 = vpop.f32.mrb[26].mxu1 }
 0x408   : > { %v3099_v56 = vmul.f32 0.5, %v1367_v55  ;;  %v2010_v57 = vpop.f32.mrb[27].mxu1  ;;  %v1373_v58 = vsel %vm556_vm7, %v3097_v53, -inf }
 0x409   : > { %1374 = vmax.xlane.f32.xlu1 %v1373_v58 }
 0x40a   : > { %v1376_v59 = vsel %vm556_vm7, %v3099_v56, -inf }
 0x40b   : > { %v3105_v60 = vpop.eup %2220  ;;  %1377 = vmax.xlane.f32.xlu0 %v1376_v59 }
 0x40c   : > { %v569_v61 = vsel %vm556_vm7, %v3105_v60, 0.0 }
 0x40d   : > { %v3109_v62 = vpop.eup %2222  ;;  %570 = vadd.xlane.f32.xlu1 %v569_v61  ;;  %v1500_v0 = vpop.f32.mrb[28].mxu1 }
 0x40e   : > { %v3111_v1 = vmul.f32 0.5, %v1500_v0  ;;  %v2021_v3 = vpop.f32.mrb[29].mxu1  ;;  %v572_v4 = vsel %vm556_vm7, %v3109_v62, 0.0 }
 0x40f   : > { %573 = vadd.xlane.f32.xlu0 %v572_v4  ;;  %v1503_v5 = vpop.f32.mrb[30].mxu1 }
 0x410   : > { %v3115_v6 = vmul.f32 0.5, %v1503_v5  ;;  %v2022_v8 = vpop.f32.mrb[31].mxu1  ;;  %v1509_v9 = vsel %vm556_vm7, %v3111_v1, -inf }
 0x411   : > { %1510 = vmax.xlane.f32.xlu1 %v1509_v9 }
 0x412   : > { %v1512_v12 = vsel %vm556_vm7, %v3115_v6, -inf }
 0x413   : > { %1513 = vmax.xlane.f32.xlu0 %v1512_v12 }
 0x422   : > { %852 = vrot.lane.b32.xlu1 %v2997_v19, %s2585_s20  ;;  %s1871_s20 = sshll.u32 %s3388_s21, 1 }
 0x429   : > { %716 = vrot.lane.b32.xlu0 %v2986_v15, %s2586_s2  ;;  %s1872_s2 = sshll.u32 %s3389_s17, 2  ;;  %s2599_s17 = smov [#allocation13]  }
 0x46e   : > { %v695_v13 = vpop.xlane.xlu0 %694 }
 0x46f   : > { %v699_v14 = vsub.f32 %v3057_v63, %v695_v13 }
 0x471   : > { %v701_v16 = vmul.f32 1.442695, %v699_v14 }
 0x472   : > { %v698_v18 = vpop.xlane.xlu0 %697 }
 0x473   : > { %2224 = vpow2.f32 %v701_v16  ;;  %v700_v20 = vsub.f32 %v3059_v2, %v698_v18 }
 0x475   : > { %v703_v22 = vmul.f32 1.442695, %v700_v20 }
 0x476   : > { %v831_v23 = vpop.xlane.xlu1 %830 }
 0x477   : > { %2226 = vpow2.f32 %v703_v22  ;;  %v835_v24 = vsub.f32 %v3065_v7, %v831_v23 }
 0x478   : > { %v834_v25 = vpop.xlane.xlu0 %833 }
 0x479   : > { %v837_v32 = vmul.f32 1.442695, %v835_v24  ;;  %v836_v19 = vsub.f32 %v3067_v10, %v834_v25 }
 0x47b   : > { %2228 = vpow2.f32 %v837_v32  ;;  %v839_v33 = vmul.f32 1.442695, %v836_v19 }
 0x47d   : > { %v3127_v15 = vpop.eup %2224  ;;  %2230 = vpow2.f32 %v839_v33 }
 0x47e   : > { %v967_v63 = vpop.xlane.xlu1 %966  ;;  %v705_v35 = vsel %vm556_vm7, %v3127_v15, 0.0 }
 0x47f   : > { %v971_v2 = vsub.f32 %v3073_v17, %v967_v63  ;;  %706 = vadd.xlane.f32.xlu1 %v705_v35 }
 0x480   : > { %v970_v36 = vpop.xlane.xlu0 %969 }
 0x481   : > { %v3132_v37 = vpop.eup %2226  ;;  %v973_v7 = vmul.f32 1.442695, %v971_v2  ;;  %v972_v38 = vsub.f32 %v3075_v21, %v970_v36 }
 0x482   : > { %v708_v10 = vsel %vm556_vm7, %v3132_v37, 0.0 }
 0x483   : > { %2232 = vpow2.f32 %v973_v7  ;;  %v975_v39 = vmul.f32 1.442695, %v972_v38  ;;  %709 = vadd.xlane.f32.xlu0 %v708_v10 }
 0x485   : > { %v3137_v40 = vpop.eup %2228  ;;  %2234 = vpow2.f32 %v975_v39 }
 0x486   : > { %v1103_v41 = vpop.xlane.xlu1 %1102  ;;  %v841_v17 = vsel %vm556_vm7, %v3137_v40, 0.0 }
 0x487   : > { %v3141_v43 = vpop.eup %2230  ;;  %v1107_v44 = vsub.f32 %v3081_v26, %v1103_v41  ;;  %842 = vadd.xlane.f32.xlu1 %v841_v17 }
 0x488   : > { %v1106_v45 = vpop.xlane.xlu0 %1105  ;;  %v844_v21 = vsel %vm556_vm7, %v3141_v43, 0.0 }
 0x489   : > { %v1109_v46 = vmul.f32 1.442695, %v1107_v44  ;;  %v1108_v48 = vsub.f32 %v3083_v34, %v1106_v45  ;;  %845 = vadd.xlane.f32.xlu0 %v844_v21 }
 0x48b   : > { %2236 = vpow2.f32 %v1109_v46  ;;  %v1111_v49 = vmul.f32 1.442695, %v1108_v48 }
 0x48d   : > { %v3147_v50 = vpop.eup %2232  ;;  %2238 = vpow2.f32 %v1111_v49 }
 0x48e   : > { %v1239_v51 = vpop.xlane.xlu1 %1238  ;;  %v977_v52 = vsel %vm556_vm7, %v3147_v50, 0.0 }
 0x48f   : > { %v3151_v54 = vpop.eup %2234  ;;  %v1243_v26 = vsub.f32 %v3089_v42, %v1239_v51  ;;  %978 = vadd.xlane.f32.xlu1 %v977_v52 }
 0x490   : > { %v1242_v55 = vpop.xlane.xlu0 %1241  ;;  %v980_v57 = vsel %vm556_vm7, %v3151_v54, 0.0 }
 0x491   : > { %v1245_v34 = vmul.f32 1.442695, %v1243_v26  ;;  %v1244_v58 = vsub.f32 %v3091_v47, %v1242_v55  ;;  %981 = vadd.xlane.f32.xlu0 %v980_v57 }
 0x493   : > { %2240 = vpow2.f32 %v1245_v34  ;;  %v1247_v59 = vmul.f32 1.442695, %v1244_v58 }
 0x495   : > { %v3157_v61 = vpop.eup %2236  ;;  %2242 = vpow2.f32 %v1247_v59 }
 0x496   : > { %v1375_v0 = vpop.xlane.xlu1 %1374  ;;  %v1113_v3 = vsel %vm556_vm7, %v3157_v61, 0.0 }
 0x497   : > { %v3161_v4 = vpop.eup %2238  ;;  %v1379_v42 = vsub.f32 %v3097_v53, %v1375_v0  ;;  %1114 = vadd.xlane.f32.xlu0 %v1113_v3 }
 0x498   : > { %v1378_v5 = vpop.xlane.xlu0 %1377  ;;  %v1116_v12 = vsel %vm556_vm7, %v3161_v4, 0.0 }
 0x499   : > { %v1381_v8 = vmul.f32 1.442695, %v1379_v42  ;;  %v1380_v9 = vsub.f32 %v3099_v56, %v1378_v5 }
 0x49a   : > { %v571_v47 = vpop.xlane.xlu1 %570 }
 0x49b   : > { %2244 = vpow2.f32 %v1381_v8  ;;  %v1383_v13 = vmul.f32 1.442695, %v1380_v9  ;;  %1117 = vadd.xlane.f32.xlu0 %v1116_v12 }
 0x49c   : > { %2246 = vrcp.f32 %v571_v47  ;;  %v574_v14 = vpop.xlane.xlu0 %573 }
 0x49d   : > { %v3167_v16 = vpop.eup %2240  ;;  %2248 = vpow2.f32 %v1383_v13 }
 0x49e   : > { %2250 = vrcp.f32 %v574_v14  ;;  %v1511_v18 = vpop.xlane.xlu1 %1510  ;;  %v1249_v53 = vsel %vm556_vm7, %v3167_v16, 0.0 }
 0x49f   : > { %v3171_v20 = vpop.eup %2242  ;;  %v1515_v56 = vsub.f32 %v3111_v1, %v1511_v18  ;;  %1250 = vadd.xlane.f32.xlu1 %v1249_v53 }
 0x4a0   : > { %v1252_v22 = vsel %vm556_vm7, %v3171_v20, 0.0  ;;  %v1514_v24 = vpop.xlane.xlu0 %1513 }
 0x4a1   : > { %v1517_v23 = vmul.f32 1.442695, %v1515_v56  ;;  %1253 = vadd.xlane.f32.xlu0 %v1252_v22 }
 0x4a3   : > { %2252 = vpow2.f32 %v1517_v23 }
 0x4a4   : > { %v717_v35 = vpop.permute.xlu0 %716 }
 0x4a5   : > { %v3176_v25 = vpop.eup %2244  ;;  %v722_v38 = vsel %vm588_vm6, %v717_v35, 0 }
 0x4a6   : > { %v2247_v32 = vpop.eup %2246  ;;  %v1385_v19 = vsel %vm556_vm7, %v3176_v25, 0.0 }
 0x4a7   : > { %v3180_v33 = vpop.eup %2248  ;;  %1386 = vadd.xlane.f32.xlu0 %v1385_v19  ;;  %v577_v1 = vmul.f32 %v2247_v32, %v3105_v60  ;;  %v1516_v60 = vsub.f32 %v3115_v6, %v1514_v24  ;;  %v853_v6 = vpop.permute.xlu1 %852 }
 0x4a8   : > { %v2251_v63 = vpop.eup %2250  ;;  %v1388_v36 = vsel %vm556_vm7, %v3180_v33, 0.0  ;;  %v858_v51 = vsel %vm588_vm6, %v853_v6, 0 }
 0x4a9   : > { %v578_v2 = vmul.f32 %v2251_v63, %v3109_v62  ;;  %v1519_v62 = vmul.f32 1.442695, %v1516_v60 }
 0x4ab   : > { %1389 = vadd.xlane.f32.xlu0 %v1388_v36  ;;  %v579_v7 = vpack.c.bf16 %v578_v2, %v577_v1  ;;  %2254 = vpow2.f32 %v1519_v62 }
 0x4ad   : > { %v3187_v10 = vpop.eup %2252  ;;  %1942 = vmatmul.mubr.msk.bf16.vlgmr.msra.gmra.mrb[4].mxu0 %vm556_vm7, %v579_v7 }
 0x4ae   : > { %v1521_v39 = vsel %vm556_vm7, %v3187_v10, 0.0  ;;  %1952 = vmatpush3.bf16.msra.mxu0 %v722_v38  ;;  %1953 = vmatprep.mubr.msk.bf16.mxu0 %vm2576_vm3, %v2575_v11 }
 0x4af   : > { %1522 = vadd.xlane.f32.xlu0 %v1521_v39  ;;  %1963 = vmatprep.subr.bf16.mxu0 %v2575_v11 }
 0x4b0   : > { %988 = vrot.lane.b32.xlu1 %v3001_v27, %s2587_s12  ;;  %s1671_s12 = sadd.s32 %s1872_s2, %s1871_s20  ;;  %s2432_s20 = sshll.u32 %s2599_s17, 4  ;;  %s2433_s20 = int_to_ptr.vmem [resolvable:$false] %s2432_s20 }
 0x4b1   : > { %s2434_s2 = scalar_lea.vmem %s2433_s20, 512 }
 0x4b5   : > { %v3200_v41 = vpop.eup %2254 }
 0x4b6   : > { %v1524_v27 = vsel %vm556_vm7, %v3200_v41, 0.0 }
 0x4c5   : > { %1124 = vrot.lane.b32.xlu0 %v3008_v28, %s2588_s15 }
 0x4c9   : > { %1260 = vrot.lane.b32.xlu0 %v3011_v29, %s2589_s9 }
 0x4cd   : > { %1396 = vrot.lane.b32.xlu0 %v3014_v30, %s2590_s5  ;;  %s3390_s5 = sld [smem:[#allocation28_spill]] }
 0x4d1   : > { %1532 = vrot.lane.b32.xlu0 %v3017_v31, %s2591_s28  ;;  %s1873_s28 = sshll.u32 %s1671_s12, 7 }
 0x4d4   : > { %1525 = vadd.xlane.f32.xlu1 %v1524_v27 }
 0x50c   : > { %v707_v17 = vpop.xlane.xlu1 %706 }
 0x50d   : > { %2256 = vrcp.f32 %v707_v17 }
 0x510   : > { %v710_v28 = vpop.xlane.xlu0 %709 }
 0x511   : > { %2258 = vrcp.f32 %v710_v28 }
 0x514   : > { %v843_v44 = vpop.xlane.xlu1 %842 }
 0x515   : > { %2260 = vrcp.f32 %v843_v44 }
 0x516   : > { %v846_v29 = vpop.xlane.xlu0 %845 }
 0x517   : > { %2262 = vrcp.f32 %v846_v29  ;;  %v2257_v45 = vpop.eup %2256 }
 0x518   : > { %v713_v21 = vmul.f32 %v2257_v45, %v3127_v15 }
 0x51b   : > { %v2259_v30 = vpop.eup %2258 }
 0x51c   : > { %v714_v46 = vmul.f32 %v2259_v30, %v3132_v37  ;;  %v979_v26 = vpop.xlane.xlu1 %978 }
 0x51e   : > { %v715_v31 = vpack.c.bf16 %v714_v46, %v713_v21  ;;  %v982_v48 = vpop.xlane.xlu0 %981 }
 0x51f   : > { %v2261_v49 = vpop.eup %2260  ;;  %2264 = vrcp.f32 %v982_v48 }
 0x520   : > { %1954 = vmatmul.mubr.msk.bf16.vlgmr.msra.gmra.mrb[8].mxu0 %vm556_vm7, %v715_v31  ;;  %v849_v15 = vmul.f32 %v2261_v49, %v3137_v40  ;;  %2266 = vrcp.f32 %v979_v26 }
 0x521   : > { %v2263_v52 = vpop.eup %2262  ;;  %1964 = vmatpush3.bf16.msra.mxu0 %v858_v51  ;;  %1965 = vmatprep.mubr.msk.bf16.mxu0 %vm2576_vm3, %v2575_v11 }
 0x522   : > { %v850_v55 = vmul.f32 %v2263_v52, %v3141_v43  ;;  %1975 = vmatprep.subr.bf16.mxu0 %v2575_v11 }
 0x524   : > { %v1115_v37 = vpop.xlane.xlu0 %1114  ;;  %v851_v57 = vpack.c.bf16 %v850_v55, %v849_v15 }
 0x528   : > { %1966 = vmatmul.mubr.msk.bf16.vlgmr.msra.gmra.mrb[12].mxu0 %vm556_vm7, %v851_v57  ;;  %v1118_v58 = vpop.xlane.xlu0 %1117 }
 0x529   : > { %1977 = vmatprep.mubr.msk.bf16.mxu0 %vm2576_vm3, %v2575_v11  ;;  %v2265_v34 = vpop.eup %2264  ;;  %2268 = vrcp.f32 %v1118_v58 }
 0x52a   : > { %v2267_v0 = vpop.eup %2266  ;;  %v986_v3 = vmul.f32 %v2265_v34, %v3151_v54  ;;  %2270 = vrcp.f32 %v1115_v37 }
 0x52b   : > { %v985_v5 = vmul.f32 %v2267_v0, %v3147_v50 }
 0x52c   : > { %v1251_v59 = vpop.xlane.xlu1 %1250 }
 0x52d   : > { %v987_v8 = vpack.c.bf16 %v986_v3, %v985_v5 }
 0x52e   : > { %v1254_v43 = vpop.xlane.xlu0 %1253 }
 0x52f   : > { %2272 = vrcp.f32 %v1254_v43 }
 0x530   : > { %v989_v42 = vpop.permute.xlu1 %988  ;;  %2274 = vrcp.f32 %v1251_v59 }
 0x531   : > { %v994_v40 = vsel %vm588_vm6, %v989_v42, 0 }
 0x532   : > { %1976 = vmatpush3.bf16.msra.mxu0 %v994_v40 }
 0x533   : > { %1987 = vmatprep.subr.bf16.mxu0 %v2575_v11  ;;  %v2269_v54 = vpop.eup %2268 }
 0x534   : > { %v1387_v9 = vpop.xlane.xlu0 %1386  ;;  %v2271_v50 = vpop.eup %2270  ;;  %v1122_v13 = vmul.f32 %v2269_v54, %v3161_v4 }
 0x535   : > { %1978 = vmatmul.mubr.msk.bf16.vlgmr.msra.gmra.mrb[16].mxu0 %vm556_vm7, %v987_v8  ;;  %v1121_v18 = vmul.f32 %v2271_v50, %v3157_v61  ;;  %v2218_v50 = vld [vmem:[#allocation12] sm:$0xff]  }
 0x536   : > { %1989 = vmatprep.mubr.msk.bf16.mxu0 %vm2576_vm3, %v2575_v11  ;;  %2030 = vmatpush3.bf16.msra.mxu1 %v2218_v50 }
 0x537   : > { %v1123_v56 = vpack.c.bf16 %v1122_v13, %v1121_v18  ;;  %v2219_v13 = vld [vmem:[#allocation12 + $0x8] sm:$0xff]   ;;  %2031 = vmatprep.subr.bf16.mxu1 %v2575_v11 }
 0x538   : > { %v1390_v47 = vpop.xlane.xlu0 %1389 }
 0x539   : > { %2276 = vrcp.f32 %v1390_v47  ;;  %v2273_v22 = vpop.eup %2272 }
 0x53a   : > { %2278 = vrcp.f32 %v1387_v9  ;;  %v2275_v32 = vpop.eup %2274  ;;  %v1258_v61 = vmul.f32 %v2273_v22, %v3171_v20  ;;  %2032 = vmatpush3.bf16.msra.mxu1 %v2219_v13 }
 0x53b   : > { %v1257_v19 = vmul.f32 %v2275_v32, %v3167_v16 }
 0x53c   : > { %v1523_v12 = vpop.xlane.xlu0 %1522 }
 0x53d   : > { %v1259_v63 = vpack.c.bf16 %v1258_v61, %v1257_v19  ;;  %2280 = vrcp.f32 %v1523_v12 }
 0x540   : > { %v1125_v14 = vpop.permute.xlu0 %1124 }
 0x541   : > { %v1130_v53 = vsel %vm588_vm6, %v1125_v14, 0 }
 0x542   : > { %1988 = vmatpush3.bf16.msra.mxu0 %v1130_v53 }
 0x543   : > { %1999 = vmatprep.subr.bf16.mxu0 %v2575_v11  ;;  %v2277_v1 = vpop.eup %2276 }
 0x544   : > { %v1261_v23 = vpop.permute.xlu0 %1260  ;;  %v2279_v2 = vpop.eup %2278  ;;  %v1394_v36 = vmul.f32 %v2277_v1, %v3180_v33 }
 0x545   : > { %1990 = vmatmul.mubr.msk.bf16.vlgmr.msra.gmra.mrb[20].mxu0 %vm556_vm7, %v1123_v56  ;;  %v1266_v24 = vsel %vm588_vm6, %v1261_v23, 0  ;;  %v1393_v7 = vmul.f32 %v2279_v2, %v3176_v25 }
 0x546   : > { %2000 = vmatpush3.bf16.msra.mxu0 %v1266_v24  ;;  %2001 = vmatprep.mubr.msk.bf16.mxu0 %vm2576_vm3, %v2575_v11 }
 0x547   : > { %2011 = vmatprep.subr.bf16.mxu0 %v2575_v11  ;;  %v1395_v38 = vpack.c.bf16 %v1394_v36, %v1393_v7  ;;  %v2281_v60 = vpop.eup %2280 }
 0x548   : > { %v1397_v4 = vpop.permute.xlu0 %1396  ;;  %v1529_v33 = vmul.f32 %v2281_v60, %v3187_v10 }
 0x549   : > { %v1402_v35 = vsel %vm588_vm6, %v1397_v4, 0 }
 0x54c   : > { %v1533_v20 = vpop.permute.xlu0 %1532 }
 0x54d   : > { %2002 = vmatmul.mubr.msk.bf16.vlgmr.msra.gmra.mrb[24].mxu0 %vm556_vm7, %v1259_v63  ;;  %v1538_v16 = vsel %vm588_vm6, %v1533_v20, 0 }
 0x54e   : > { %2012 = vmatpush3.bf16.msra.mxu0 %v1402_v35  ;;  %2013 = vmatprep.mubr.msk.bf16.mxu0 %vm2576_vm3, %v2575_v11  ;;  %v1866_v35 = vld [vmem:[%s3390_s5] ss:$0 sm:$0xff] }
 0x54f   : > { %2023 = vmatprep.subr.bf16.mxu0 %v2575_v11 }
 0x555   : > { %2014 = vmatmul.mubr.msk.bf16.vlgmr.msra.gmra.mrb[28].mxu0 %vm556_vm7, %v1395_v38 }
 0x556   : > { %2024 = vmatpush3.bf16.msra.mxu0 %v1538_v16  ;;  %2025 = vmatprep.mubr.msk.bf16.mxu0 %vm2576_vm3, %v2575_v11 }
 0x561   : > { %v1526_v39 = vpop.xlane.xlu1 %1525 }
 0x562   : > { %2282 = vrcp.f32 %v1526_v39 }
 0x56c   : > { %v2283_v62 = vpop.eup %2282 }
 0x56d   : > { %v1530_v27 = vmul.f32 %v2283_v62, %v3200_v41 }
 0x56f   : > { %v1531_v6 = vpack.c.bf16 %v1530_v27, %v1529_v33 }
 0x571   : > { %2026 = vmatmul.mubr.msk.bf16.vlgmr.msra.gmra.mrb[32].mxu0 %vm556_vm7, %v1531_v6 }
 0x580   : > { %v626_v25 = vpop.f32.mrb[4].mxu0 }
 0x581   : > { %v1943_v17 = vpop.f32.mrb[5].mxu0 }
 0x582   : > { %v629_v28 = vpop.f32.mrb[6].mxu0 }
 0x583   : > { %v633_v44 = vpack.c.bf16 %v629_v28, %v626_v25  ;;  %v1944_v29 = vpop.f32.mrb[7].mxu0 }
 0x585   : > { %634 = vst.msk [vmem:[#allocation3] sm:$0xff] %vm506_vm4, %v633_v44 }
 0x5f3   : > { %v758_v45 = vpop.f32.mrb[8].mxu0 }
 0x5f4   : > { %v1955_v30 = vpop.f32.mrb[9].mxu0 }
 0x5f5   : > { %v761_v21 = vpop.f32.mrb[10].mxu0 }
 0x5f6   : > { %v765_v46 = vpack.c.bf16 %v761_v21, %v758_v45  ;;  %v1956_v31 = vpop.f32.mrb[11].mxu0 }
 0x5f8   : > { %767 = vrot.lane.b32.xlu0 %v765_v46, %s2592_s11  ;;  %s1674_s11 = sshll.u32 %s2976_s19, 4  ;;  %s3266_s11 = int_to_ptr.vmem [resolvable:$true] %s1674_s11 }
 0x5f9   : > { %s2428_s21 = scalar_lea.vmem %s3266_s11, 256  ;;  %p2435_p12 = scmp.lt.s32.totalorder %s3266_s11, %s2433_s20 }
 0x5fa   : > { %p2429_p9 = scmp.ne.s32.totalorder %s3266_s11, %s2428_s21  ;;  %p2436_p5 = scmp.lt.s32.totalorder %s2434_s2, %s2428_s21 }
 0x5fb   : > { %v894_v10 = vpop.f32.mrb[12].mxu0 }
 0x5fc   : > { %v1967_v48 = vpop.f32.mrb[13].mxu0  ;;  %p2430_p2 = pnand %p2429_p9, %p3392_p11  ;;  %p2437_p7 = por %p2436_p5, %p2435_p12 }
 0x5fd   : > { %v897_v41 = vpop.f32.mrb[14].mxu0 }
 0x5fe   : > { %v901_v49 = vpack.c.bf16 %v897_v41, %v894_v10  ;;  %v1968_v51 = vpop.f32.mrb[15].mxu0  ;;  %p2431_p6 = pneg %p2430_p2 }
 0x600   : > { %903 = vrot.lane.b32.xlu1 %v901_v49, %s2593_s8  ;;  %p2438_p0 = pnand %p2437_p7, %p2431_p6 }
 0x608   : > { %v1030_v52 = vpop.f32.mrb[16].mxu0 }
 0x609   : > { %v1979_v26 = vpop.f32.mrb[17].mxu0 }
 0x60a   : > { %v1033_v55 = vpop.f32.mrb[18].mxu0 }
 0x60b   : > { %v1037_v15 = vpack.c.bf16 %v1033_v55, %v1030_v52  ;;  %v1980_v37 = vpop.f32.mrb[19].mxu0 }
 0x60d   : > { %1039 = vrot.lane.b32.xlu0 %v1037_v15, %s2594_s13 }
 0x618   : > { %v1166_v57 = vpop.f32.mrb[20].mxu0 }
 0x619   : > { %v1991_v34 = vpop.f32.mrb[21].mxu0 }
 0x61a   : > { %v1169_v58 = vpop.f32.mrb[22].mxu0 }
 0x61b   : > { %v1173_v59 = vpack.c.bf16 %v1169_v58, %v1166_v57  ;;  %v1992_v0 = vpop.f32.mrb[23].mxu0 }
 0x61d   : > { %1175 = vrot.lane.b32.xlu0 %v1173_v59, %s2595_s4 }
 0x620   : > { %v1302_v3 = vpop.f32.mrb[24].mxu0 }
 0x621   : > { %v2003_v43 = vpop.f32.mrb[25].mxu0 }
 0x622   : > { %v1305_v42 = vpop.f32.mrb[26].mxu0 }
 0x623   : > { %v1309_v5 = vpack.c.bf16 %v1305_v42, %v1302_v3  ;;  %v2004_v40 = vpop.f32.mrb[27].mxu0 }
 0x625   : > { %1311 = vrot.lane.b32.xlu0 %v1309_v5, %s2596_s16  ;;  %s3391_s16 = sld [smem:[#allocation29_spill]] }
 0x628   : > { %v1438_v8 = vpop.f32.mrb[28].mxu0 }
 0x629   : > { %v2015_v9 = vpop.f32.mrb[29].mxu0 }
 0x62a   : > { %v1441_v47 = vpop.f32.mrb[30].mxu0 }
 0x62b   : > { %v1445_v54 = vpack.c.bf16 %v1441_v47, %v1438_v8  ;;  %v2016_v12 = vpop.f32.mrb[31].mxu0 }
 0x62d   : > { %1447 = vrot.lane.b32.xlu0 %v1445_v54, %s2597_s27  ;;  %s3262_s27 = scalar_lea.hbm %s3391_s16, %s1873_s28 }
 0x644   : > { %v1574_v14 = vpop.f32.mrb[32].mxu0 }
 0x645   : > { %v2027_v18 = vpop.f32.mrb[33].mxu0 }
 0x646   : > { %v1577_v53 = vpop.f32.mrb[34].mxu0 }
 0x647   : > { %v1581_v56 = vpack.c.bf16 %v1577_v53, %v1574_v14  ;;  %v2028_v22 = vpop.f32.mrb[35].mxu0 }
 0x649   : > { %1583 = vrot.lane.b32.xlu1 %v1581_v56, %s2598_s18  ;;  %s1659_s18 = scalar_lea.sflag [#allocation6], %s2952_s14 }
 0x66a   : > { %v768_v23 = vpop.permute.xlu0 %767 }
 0x66b   : > { %771 = vst.msk [vmem:[#allocation3] sm:$0xff] %vm770_vm8, %v768_v23 }
 0x672   : > { %v904_v24 = vpop.permute.xlu1 %903 }
 0x673   : > { %907 = vst.msk [vmem:[#allocation3] sm:$0xff] %vm906_vm9, %v904_v24 }
 0x67f   : > { %v1040_v32 = vpop.permute.xlu0 %1039 }
 0x680   : > { %1043 = vst.msk [vmem:[#allocation3] sm:$0xff] %vm1042_vm10, %v1040_v32 }
 0x68f   : > { %v1176_v11 = vpop.permute.xlu0 %1175 }
 0x690   : > { %1179 = vst.msk [vmem:[#allocation3] sm:$0xff] %vm1178_vm11, %v1176_v11 }
 0x697   : > { %v1312_v61 = vpop.permute.xlu0 %1311 }
 0x698   : > { %1315 = vst.msk [vmem:[#allocation3] sm:$0xff] %vm1314_vm12, %v1312_v61 }
 0x69f   : > { %v1448_v4 = vpop.permute.xlu0 %1447 }
 0x6a0   : > { %1451 = vst.msk [vmem:[#allocation3] sm:$0xff] %vm1450_vm13, %v1448_v4 }
 0x6bb   : > { %v1584_v19 = vpop.permute.xlu1 %1583 }
 0x6bc   : > { %1587 = vst.msk [vmem:[#allocation3] sm:$0xff] %vm1586_vm14, %v1584_v19 }
 0x6c3   : > { %v1588_v63 = vld [vmem:[#allocation3] sm:$0xff] }
 0x6c4   : > { %2034 = vmatmul.mubr.msk.bf16.vlgmr.msra.gmra.mrb[32].mxu1 %vm459_vm5, %v1588_v63 }
 0x797   : > { %v1649_v1 = vpop.f32.mrb[32].mxu1 }
 0x798   : > { %v1650_v2 = vadd.f32 %v1866_v35, %v1649_v1  ;;  %v2035_v36 = vpop.f32.mrb[33].mxu1 }
 0x799   : > { %v1652_v20 = vpop.f32.mrb[34].mxu1 }
 0x79a   : > { %1656 = vst.msk [vmem:[%s2976_s19] sm:$0xff] %vm459_vm5, %v1650_v2  ;;  %v1653_v7 = vadd.f32 %v1866_v35, %v1652_v20  ;;  %v2036_v38 = vpop.f32.mrb[35].mxu1 }
 0x79c   : > { %1657 = vst.msk [vmem:[%s2976_s19 + $0x8] sm:$0xff] %vm459_vm5, %v1653_v7 }
 0x79d   : > { %2441 = shalt.err (!%p2438_p0)
}
 0x79e   : > { %s2442_s19 = scalar_lea.hbm %s3262_s27, 256  ;;  %s2446_s9 = scalar_lea.hbm %s3391_s16, 1024 }
 0x79f   : > { %p2443_p3 = scmp.ne.s32.totalorder %s3262_s27, %s2442_s19  ;;  %p2447_p1 = scmp.lt.u32.totalorder %s3262_s27, %s3391_s16 }
 0x7a0   : > { %p2448_p4 = scmp.lt.u32.totalorder %s2446_s9, %s2442_s19  ;;  %p2450_p9 = scmp.lt.u32.totalorder %s2442_s19, %s3262_s27 }
 0x7a1   : > { %p2444_p13 = pnand %p2443_p3, %p3392_p11 }
 0x7a2   : > { %p2449_p10 = por %p2448_p4, %p2447_p1 }
 0x7a3   : > { %p2445_p8 = pneg %p2444_p13 }
 0x7a4   : > { %p2451_p2 = por %p2450_p9, %p2449_p10 }
 0x7a6   : > { %p2452_p6 = pnand %p2451_p2, %p2445_p8 }
 0x7a8   : > { %2455 = shalt.err (!%p2452_p6)
}
 0x7a9   : > { %s2600_s13 = smov 128  }
 0x7aa   : > { %2053 = dma.vmem_to_hbm [thread:$0]  (%p3392_p11), %s3266_s11, 256, %s3262_s27, %s1659_s18, %s2600_s13, %s2600_s13, %s2593_s8  }
 0x7ab PF: > { %s3393_s4 = sld [smem:[#allocation19_spill]]  ;;  %s3394_s21 = sld [smem:[#allocation23_spill]] }
 0x7ac   : > { %p2083_p12 = scmp.ge.s32.totalorder %s2562_s7, 2 }
 0x7b1   : > { %s1689_s17 = sand.u32 1, %s3393_s4   ;;  %p3395_p5 = scmp.ne.s32.totalorder %s3394_s21, 0 }
 0x7b2   : > { %s1690_s20 = scalar_lea.sflag [#allocation6], %s1689_s17 }
 0x7b3   : > { %p2073_p7 = pnand %p2083_p12, %p3395_p5 }
 0x7b5   : > { %2517 = dma.done.wait (!%p2073_p7), %s1690_s20, 256  }
 0x7b6   : > { %2519 = vsyncadd (!%p2073_p7), %s1690_s20, 4294967040  ;;  %s26_s7 = sadd.s32 1, %s2562_s7   ;;  %s3396_s10 = smov %s2845_s24 }
 0x7b7   : > { %p23_p0 = scmp.ge.s32.totalorder %s26_s7, 6   ;;  %s3397_s14 = sld [smem:[#allocation24_spill]] }
 0x7b8   : > { %s3398_s21 = smov %s2526_s22  ;;  %s3399_s22 = smov %s2530_s23 }
 0x7b9   : > { %s3400_s23 = smov %s2894_s3  ;;  %s3401_s24 = smov %s2538_s25 }
 0x7ba   : > { %s3402_s25 = smov %s2542_s26  ;;  %s3403_s26 = smov %s3396_s10 }
 0x7bb   : > { %s3404_s27 = smov %s2554_s29  ;;  %s3405_s28 = smov %s2558_s30 }
 0x7bc   : > { %s3406_s29 = smov %s3409_s6  ;;  %25 = sbr.rel (!%p23_p0) target bundleno = 18 (0x12), region = 118 }
 0x7bd   : > { %s3407_s30 = smov %s3397_s14 }
 0x7c3   :  { %1695 = vsyncpa [#allocation5], 1 }
 0x7c4   :  { %1697 = vsyncpa [#allocation5 + $0x1], 1 }
 0x7c5   :  { %1698 = vsyncpa [#allocation8], 1 }
 0x7c6   :  { %1700 = vsyncpa [#allocation8 + $0x1], 1 }
 0x7c7   :  { %1701 = vsyncpa [#allocation11], 1 }
 0x7c8   :  { %1702 = vsyncpa [#allocation6], 1 }
 0x7c9   :  { %1704 = vsyncpa [#allocation6 + $0x1], 1 }

</bundles_post_ra>
